<compile_context>
chip_gen: v5e
topology: v5e:2x2
jax: 0.10.0
libtpu: 0.0.40
codegen_flags: <defaults>
</compile_context>

<pallas_src>
import functools

import jax
import jax.numpy as jnp
from jax import lax
from jax.experimental import pallas as pl
from jax.experimental.pallas import tpu as pltpu

EPS = 1e-5
MATMUL_DTYPE = jnp.float32   # set to jnp.bfloat16 for more MXU throughput (relax tolerance)


def _round_up(x, m):
    return (x + m - 1) // m * m


def _pad_channels(c):
    # Lane-dense (x128) only when the channel count is already large; otherwise x8 padding
    # keeps HBM traffic low (masked stores beat 2x-16x more bytes on a memory-bound kernel).
    return _round_up(c, 128) if c >= 128 else _round_up(c, 8)


# ----------------------------------------------------------------------------- kernel
def _conv3x3_kernel(x_ref, halo_ref, w_ref, scale_ref, shift_ref, y_ref, stats_ref,
                    *, apply_input_act):
    """One (batch, row-tile) step: [optional fused BN+ReLU of input] -> 3x3 conv -> stats.

    x_ref     : (1, th, W, Cin_p)     main rows of the input feature map (pre-activation)
    halo_ref  : (1, 1, 2, W, Cin_p)   rows ti*th-1 and ti*th+th (sidecar; masked at borders)
    w_ref     : (3, 3*Cin_p, Cout_p)  per-dy weight slabs (dx-major along K)
    scale_ref : (1, Cin_p)            BN scale of the input (used when apply_input_act)
    shift_ref : (1, Cin_p)            BN shift of the input
    y_ref     : (1, th, W, Cout_p)    pre-BN conv output tile
    stats_ref : (1, 1, 8, Cout_p)     row0 = per-tile sum, row1 = per-tile centered M2
    """
    th, w, cin_p = x_ref.shape[1], x_ref.shape[2], x_ref.shape[3]
    cout_p = w_ref.shape[2]

    x = x_ref[0]           # (th, W, Cin_p)
    hal = halo_ref[0, 0]   # (2, W, Cin_p)
    top = hal[0:1]
    bot = hal[1:2]

    if apply_input_act:
        # Fused BatchNorm(scale, shift) + ReLU of the previous conv output.  Boundary halo
        # rows must be the zero-padding of the ACTIVATED map -> kill them with scalar
        # validity factors (no full-tile iota masks).
        ti = pl.program_id(1)
        nt = pl.num_programs(1)
        scale = scale_ref[...]
        shift = shift_ref[...]
        x = jnp.maximum(x * scale + shift, 0.0)
        top = jnp.maximum(top * scale + shift, 0.0) * jnp.where(ti > 0, 1.0, 0.0)
        bot = jnp.maximum(bot * scale + shift, 0.0) * jnp.where(ti < nt - 1, 1.0, 0.0)

    # Assemble the (th+2, W+2) window: halo rows spliced in, literal zero padding columns.
    win = jnp.concatenate([top, x, bot], axis=0)                     # (th+2, W, Cin_p)
    zcol = jnp.zeros((th + 2, 1, cin_p), jnp.float32)
    win = jnp.concatenate([zcol, win, zcol], axis=1)                 # (th+2, W+2, Cin_p)

    # im2col chunked per dy: 3 matmuls with K = 3*Cin_p accumulated in f32 (bounds the live
    # patch to ~3x the input tile instead of 9x).
    # TODO(synk): for tiny Cin (conv1) a lane-packed (w, cin) patch would cut the relayout
    # cost further; left as-is since conv1 is a small fraction of total work.
    acc = None
    for dy in range(3):
        rows = win[dy:dy + th]                                       # (th, W+2, Cin_p)
        patch = jnp.concatenate(
            [rows[:, 0:w], rows[:, 1:w + 1], rows[:, 2:w + 2]], axis=-1
        ).reshape(th * w, 3 * cin_p).astype(MATMUL_DTYPE)
        contrib = jnp.dot(patch, w_ref[dy], preferred_element_type=jnp.float32)
        acc = contrib if dy == 0 else acc + contrib

    y = acc.reshape(th, w, cout_p)
    y_ref[...] = y.reshape(1, th, w, cout_p)

    # Per-tile BatchNorm statistics: sum and CENTERED second moment (Chan combine in the
    # wrapper), written as a full 8-sublane block so the store is unmasked.
    s = jnp.sum(jnp.sum(y, axis=0), axis=0, keepdims=True)           # (1, Cout_p)
    mean_t = s * (1.0 / (th * w))
    d = y - mean_t
    m2 = jnp.sum(jnp.sum(d * d, axis=0), axis=0, keepdims=True)      # (1, Cout_p)
    stats_ref[...] = jnp.concatenate(
        [s, m2, jnp.zeros((6, cout_p), jnp.float32)], axis=0).reshape(1, 1, 8, cout_p)


# --------------------------------------------------------------------------- call glue
def _vmem_limit_bytes():
    cap = 64 * 1024 * 1024                      # assume the smallest (v7x) if query fails
    try:
        info = pltpu.get_tpu_info()
        cap = int(getattr(info, "vmem_capacity_bytes", cap))
    except Exception:
        pass
    return min(cap // 2, 64 * 1024 * 1024)      # ~32 MiB on v7x, 64 MiB on v5e/v6e


def _est_step_vmem(th, w, cin_p, cout_p):
    f32 = 4
    in_blk = th * w * cin_p * f32
    halo_blk = 2 * w * cin_p * f32
    out_blk = th * w * cout_p * f32
    stats_blk = 8 * cout_p * f32
    wts = 9 * cin_p * cout_p * f32
    pipelined = 2 * (in_blk + halo_blk + out_blk + stats_blk + wts)   # double-buffered I/O
    win = (th + 2) * (w + 2) * cin_p * f32
    tmp = in_blk + 3 * win + 3 * th * w * cin_p * f32 + 2 * out_blk   # window/patch/acc
    return pipelined + tmp


def _pick_tile_rows(h, w, cin_p, cmid_p, cout_p, budget):
    """Largest divisor of H whose per-step VMEM estimate fits; prefer >=2 row tiles."""
    def est(th):
        return max(_est_step_vmem(th, w, cin_p, cmid_p),
                   _est_step_vmem(th, w, cmid_p, cout_p))
    divs = [d for d in range(1, h + 1) if h % d == 0]
    fit = [d for d in divs if est(d) <= budget]
    if not fit:
        return 1
    pref = [d for d in fit if h // d >= 2]
    return max(pref) if pref else max(fit)


def _row_halo(fmap, th):
    """(N, H, W, C) -> (N, nt, 2, W, C): rows ti*th-1 / ti*th+th per tile (zeros at borders).
    Reads/writes only 2 rows per tile -- negligible HBM traffic (replaces pad + overlap stack)."""
    n, h, w, c = fmap.shape
    zrow = jnp.zeros((n, 1, w, c), fmap.dtype)
    top = jnp.concatenate([zrow, fmap[:, th - 1:h - 1:th]], axis=1)
    bot = jnp.concatenate([fmap[:, th:h:th], zrow], axis=1)
    return jnp.stack([top, bot], axis=2)


def _conv3x3_call(x, halo, w_folded, scale, shift, *, th, apply_input_act, vmem_limit):
    n, h, w, cin_p = x.shape
    nt = h // th
    cout_p = w_folded.shape[-1]
    kern = functools.partial(_conv3x3_kernel, apply_input_act=apply_input_act)
    y, stats = pl.pallas_call(
        kern,
        grid=(n, nt),
        in_specs=[
            pl.BlockSpec((1, th, w, cin_p), lambda bi, ti: (bi, ti, 0, 0)),
            pl.BlockSpec((1, 1, 2, w, cin_p), lambda bi, ti: (bi, ti, 0, 0, 0)),
            pl.BlockSpec((3, 3 * cin_p, cout_p), lambda bi, ti: (0, 0, 0)),
            pl.BlockSpec((1, cin_p), lambda bi, ti: (0, 0)),
            pl.BlockSpec((1, cin_p), lambda bi, ti: (0, 0)),
        ],
        out_specs=[
            pl.BlockSpec((1, th, w, cout_p), lambda bi, ti: (bi, ti, 0, 0)),
            pl.BlockSpec((1, 1, 8, cout_p), lambda bi, ti: (bi, ti, 0, 0)),
        ],
        out_shape=[
            jax.ShapeDtypeStruct((n, h, w, cout_p), jnp.float32),
            jax.ShapeDtypeStruct((n, nt, 8, cout_p), jnp.float32),
        ],
        compiler_params=pltpu.CompilerParams(
            dimension_semantics=("parallel", "parallel"),
            vmem_limit_bytes=vmem_limit),
    )(x, halo, w_folded, scale, shift)
    return y, stats


def _bn_scale_shift(stats, gamma_p, beta_p, tile_count, total_count):
    """Chan-combine per-tile (sum, centered M2) -> fold mean/var/gamma/beta into (scale, shift)."""
    s = stats[:, :, 0, :]                                   # (N, nt, C_pad)
    m2 = stats[:, :, 1, :]
    gmean = jnp.sum(s, axis=(0, 1)) / total_count
    tmean = s / tile_count
    gm2 = jnp.sum(m2, axis=(0, 1)) + tile_count * jnp.sum((tmean - gmean) ** 2, axis=(0, 1))
    var = gm2 / total_count                                 # biased, matches BatchNorm2d
    scale = gamma_p * lax.rsqrt(var + EPS)
    shift = beta_p - gmean * scale
    return scale.reshape(1, -1), shift.reshape(1, -1)


@jax.jit
def double_conv(x_nchw, w1, g1, b1, w2, g2, b2):
    """x_nchw: (N, Cin, H, W) f32 (PyTorch layout); conv weights HWIO. -> (N, Cout, H, W)."""
    n, cin, h, w = x_nchw.shape
    cmid, cout = w1.shape[-1], w2.shape[-1]

    cin_p = _pad_channels(cin)
    cmid_p = _pad_channels(cmid)
    cout_p = _pad_channels(cout)

    vmem_limit = _vmem_limit_bytes()
    th = _pick_tile_rows(h, w, cin_p, cmid_p, cout_p, int(vmem_limit * 0.9))
    tile_count = float(th * w)
    total_count = float(n * h * w)

    # ---- layout plumbing (small, one-shot): NHWC + channel pad; folded/padded weights ----
    x = jnp.transpose(x_nchw, (0, 2, 3, 1)).astype(jnp.float32)
    x = jnp.pad(x, ((0, 0), (0, 0), (0, 0), (0, cin_p - cin)))

    w1f = jnp.pad(w1.astype(jnp.float32),
                  ((0, 0), (0, 0), (0, cin_p - cin), (0, cmid_p - cmid))
                  ).reshape(3, 3 * cin_p, cmid_p).astype(MATMUL_DTYPE)
    w2f = jnp.pad(w2.astype(jnp.float32),
                  ((0, 0), (0, 0), (0, cmid_p - cmid), (0, cout_p - cout))
                  ).reshape(3, 3 * cmid_p, cout_p).astype(MATMUL_DTYPE)
    g1p = jnp.pad(g1.astype(jnp.float32), (0, cmid_p - cmid))
    b1p = jnp.pad(b1.astype(jnp.float32), (0, cmid_p - cmid))
    g2p = jnp.pad(g2.astype(jnp.float32), (0, cout_p - cout))
    b2p = jnp.pad(b2.astype(jnp.float32), (0, cout_p - cout))

    ones_in = jnp.ones((1, cin_p), jnp.float32)     # unused (apply_input_act=False)
    zeros_in = jnp.zeros((1, cin_p), jnp.float32)

    # ---- conv1: pre-BN output + per-tile stats for BN1 ----
    y1, st1 = _conv3x3_call(x, _row_halo(x, th), w1f, ones_in, zeros_in,
                            th=th, apply_input_act=False, vmem_limit=vmem_limit)
    scale1, shift1 = _bn_scale_shift(st1, g1p, b1p, tile_count, total_count)

    # ---- conv2: BN1+ReLU fused in-kernel with the conv; emits stats for BN2 ----
    y2, st2 = _conv3x3_call(y1, _row_halo(y1, th), w2f, scale1, shift1,
                            th=th, apply_input_act=True, vmem_limit=vmem_limit)
    scale2, shift2 = _bn_scale_shift(st2, g2p, b2p, tile_count, total_count)

    # ---- BN2 + ReLU left to XLA so it fuses with the channel slice + NHWC->NCHW transpose ----
    out = jnp.maximum(y2 * scale2.reshape(1, 1, 1, -1) + shift2.reshape(1, 1, 1, -1), 0.0)
    return jnp.transpose(out[..., :cout], (0, 3, 1, 2))


@jax.jit
def double_conv_reference(x_nchw, w1, g1, b1, w2, g2, b2):
    """Pure-JAX reference (lax.conv) with identical semantics, for validation."""
    def conv(x, wt):
        return lax.conv_general_dilated(
            x, wt, window_strides=(1, 1), padding="SAME",
            dimension_numbers=("NHWC", "HWIO", "NHWC"))

    def bn_relu(x, g, b):
        mean = jnp.mean(x, axis=(0, 1, 2), keepdims=True)
        var = jnp.mean((x - mean) ** 2, axis=(0, 1, 2), keepdims=True)
        return jnp.maximum((x - mean) * lax.rsqrt(var + EPS) * g + b, 0.0)

    x = jnp.transpose(x_nchw, (0, 2, 3, 1)).astype(jnp.float32)
    hid = bn_relu(conv(x, w1), g1, b1)
    hid = bn_relu(conv(hid, w2), g2, b2)
    return jnp.transpose(hid, (0, 3, 1, 2))


if __name__ == "__main__":
    # DoubleConv(in_channels=4, out_channels=8) on a small input.
    N, Cin, Cout, H, W = 2, 4, 8, 16, 16

    key = jax.random.PRNGKey(0)
    kx, kw1, kw2, kg1, kb1, kg2, kb2 = jax.random.split(key, 7)

    x = jax.random.normal(kx, (N, Cin, H, W), dtype=jnp.float32)
    w1 = jax.random.normal(kw1, (3, 3, Cin, Cout), dtype=jnp.float32) * 0.1
    w2 = jax.random.normal(kw2, (3, 3, Cout, Cout), dtype=jnp.float32) * 0.1
    g1 = 1.0 + 0.1 * jax.random.normal(kg1, (Cout,), dtype=jnp.float32)
    b1 = 0.1 * jax.random.normal(kb1, (Cout,), dtype=jnp.float32)
    g2 = 1.0 + 0.1 * jax.random.normal(kg2, (Cout,), dtype=jnp.float32)
    b2 = 0.1 * jax.random.normal(kb2, (Cout,), dtype=jnp.float32)

    out = jax.block_until_ready(double_conv(x, w1, g1, b1, w2, g2, b2))
    ref = jax.block_until_ready(double_conv_reference(x, w1, g1, b1, w2, g2, b2))

    assert out.shape == (N, Cout, H, W), out.shape
    err = float(jnp.max(jnp.abs(out - ref)))
    assert jnp.allclose(out, ref, rtol=1e-4, atol=1e-4), err
    print("KERNEL_OK")
</pallas_src>

<mosaic_0001>
module attributes {stable_mosaic.version = 11 : i64} {
  func.func @_conv3x3_kernel(%arg0: i32, %arg1: i32, %arg2: memref<1x8x16x8xf32, #tpu.memory_space<vmem>>, %arg3: memref<1x1x2x16x8xf32, #tpu.memory_space<vmem>>, %arg4: memref<3x24x8xf32, #tpu.memory_space<vmem>>, %arg5: memref<1x8xf32, #tpu.memory_space<vmem>>, %arg6: memref<1x8xf32, #tpu.memory_space<vmem>>, %arg7: memref<1x8x16x8xf32, #tpu.memory_space<vmem>>, %arg8: memref<1x1x8x8xf32, #tpu.memory_space<vmem>>) attributes {dimension_semantics = [#tpu.dimension_semantics<parallel>, #tpu.dimension_semantics<parallel>], iteration_bounds = array<i64: 2, 2>, scalar_prefetch = 0 : i64, scratch_operands = 0 : i64, tpu.core_type = #tpu.core_type<tc>, window_params = [{transform_indices = @transform_0, window_bounds = array<i64: 1, 8, 16, 8>}, {transform_indices = @transform_1, window_bounds = array<i64: 1, 1, 2, 16, 8>}, {pipeline_mode = #tpu.pipeline_mode<synchronous>, transform_indices = @transform_2, window_bounds = array<i64: 3, 24, 8>}, {pipeline_mode = #tpu.pipeline_mode<synchronous>, transform_indices = @transform_3, window_bounds = array<i64: 1, 8>}, {pipeline_mode = #tpu.pipeline_mode<synchronous>, transform_indices = @transform_4, window_bounds = array<i64: 1, 8>}, {transform_indices = @transform_5, window_bounds = array<i64: 1, 8, 16, 8>}, {transform_indices = @transform_6, window_bounds = array<i64: 1, 1, 8, 8>}]} {
    %c0 = arith.constant 0 : index
    %c0_0 = arith.constant 0 : index
    %c0_1 = arith.constant 0 : index
    %c0_2 = arith.constant 0 : index
    %0 = vector.load %arg2[%c0, %c0_0, %c0_1, %c0_2] : memref<1x8x16x8xf32, #tpu.memory_space<vmem>>, vector<1x8x16x8xf32>
    %1 = vector.shape_cast %0 : vector<1x8x16x8xf32> to vector<8x16x8xf32>
    %c0_3 = arith.constant 0 : index
    %c0_4 = arith.constant 0 : index
    %c0_5 = arith.constant 0 : index
    %c0_6 = arith.constant 0 : index
    %c0_7 = arith.constant 0 : index
    %2 = vector.load %arg3[%c0_3, %c0_4, %c0_5, %c0_6, %c0_7] : memref<1x1x2x16x8xf32, #tpu.memory_space<vmem>>, vector<1x1x2x16x8xf32>
    %3 = vector.shape_cast %2 : vector<1x1x2x16x8xf32> to vector<2x16x8xf32>
    %4 = vector.extract_strided_slice %3 {offsets = [0, 0, 0], sizes = [1, 16, 8], strides = [1, 1, 1]} : vector<2x16x8xf32> to vector<1x16x8xf32>
    %5 = vector.extract_strided_slice %3 {offsets = [1, 0, 0], sizes = [1, 16, 8], strides = [1, 1, 1]} : vector<2x16x8xf32> to vector<1x16x8xf32>
    %6 = tpu.concatenate %4, %1, %5 in 0 : vector<1x16x8xf32>, vector<8x16x8xf32>, vector<1x16x8xf32> -> vector<10x16x8xf32>
    %cst = arith.constant 0.000000e+00 : f32
    %7 = vector.broadcast %cst : f32 to vector<10x1x8xf32>
    %8 = tpu.concatenate %7, %6, %7 in 1 : vector<10x1x8xf32>, vector<10x16x8xf32>, vector<10x1x8xf32> -> vector<10x18x8xf32>
    %9 = vector.extract_strided_slice %8 {offsets = [0, 0, 0], sizes = [8, 18, 8], strides = [1, 1, 1]} : vector<10x18x8xf32> to vector<8x18x8xf32>
    %10 = vector.extract_strided_slice %9 {offsets = [0, 0, 0], sizes = [8, 16, 8], strides = [1, 1, 1]} : vector<8x18x8xf32> to vector<8x16x8xf32>
    %11 = vector.extract_strided_slice %9 {offsets = [0, 1, 0], sizes = [8, 16, 8], strides = [1, 1, 1]} : vector<8x18x8xf32> to vector<8x16x8xf32>
    %12 = vector.extract_strided_slice %9 {offsets = [0, 2, 0], sizes = [8, 16, 8], strides = [1, 1, 1]} : vector<8x18x8xf32> to vector<8x16x8xf32>
    %13 = tpu.concatenate %10, %11, %12 in 2 : vector<8x16x8xf32>, vector<8x16x8xf32>, vector<8x16x8xf32> -> vector<8x16x24xf32>
    %14 = vector.shape_cast %13 : vector<8x16x24xf32> to vector<128x24xf32>
    %c0_8 = arith.constant 0 : index
    %c0_9 = arith.constant 0 : index
    %c0_10 = arith.constant 0 : index
    %15 = vector.load %arg4[%c0_8, %c0_9, %c0_10] : memref<3x24x8xf32, #tpu.memory_space<vmem>>, vector<1x24x8xf32>
    %16 = vector.shape_cast %15 : vector<1x24x8xf32> to vector<24x8xf32>
    %cst_11 = arith.constant dense<0.000000e+00> : vector<128x8xf32>
    %17 = tpu.matmul %14, %16, %cst_11 {dimension_numbers = #tpu.dot_dimension_numbers<[1], [0], [0], [1], [0, 0, 1, 1], [], []>} : vector<128x24xf32>, vector<24x8xf32>, vector<128x8xf32> -> vector<128x8xf32>
    %18 = vector.extract_strided_slice %8 {offsets = [1, 0, 0], sizes = [8, 18, 8], strides = [1, 1, 1]} : vector<10x18x8xf32> to vector<8x18x8xf32>
    %19 = vector.extract_strided_slice %18 {offsets = [0, 0, 0], sizes = [8, 16, 8], strides = [1, 1, 1]} : vector<8x18x8xf32> to vector<8x16x8xf32>
    %20 = vector.extract_strided_slice %18 {offsets = [0, 1, 0], sizes = [8, 16, 8], strides = [1, 1, 1]} : vector<8x18x8xf32> to vector<8x16x8xf32>
    %21 = vector.extract_strided_slice %18 {offsets = [0, 2, 0], sizes = [8, 16, 8], strides = [1, 1, 1]} : vector<8x18x8xf32> to vector<8x16x8xf32>
    %22 = tpu.concatenate %19, %20, %21 in 2 : vector<8x16x8xf32>, vector<8x16x8xf32>, vector<8x16x8xf32> -> vector<8x16x24xf32>
    %23 = vector.shape_cast %22 : vector<8x16x24xf32> to vector<128x24xf32>
    %c1 = arith.constant 1 : index
    %c0_12 = arith.constant 0 : index
    %c0_13 = arith.constant 0 : index
    %24 = vector.load %arg4[%c1, %c0_12, %c0_13] : memref<3x24x8xf32, #tpu.memory_space<vmem>>, vector<1x24x8xf32>
    %25 = vector.shape_cast %24 : vector<1x24x8xf32> to vector<24x8xf32>
    %cst_14 = arith.constant dense<0.000000e+00> : vector<128x8xf32>
    %26 = tpu.matmul %23, %25, %cst_14 {dimension_numbers = #tpu.dot_dimension_numbers<[1], [0], [0], [1], [0, 0, 1, 1], [], []>} : vector<128x24xf32>, vector<24x8xf32>, vector<128x8xf32> -> vector<128x8xf32>
    %27 = arith.addf %17, %26 : vector<128x8xf32>
    %28 = vector.extract_strided_slice %8 {offsets = [2, 0, 0], sizes = [8, 18, 8], strides = [1, 1, 1]} : vector<10x18x8xf32> to vector<8x18x8xf32>
    %29 = vector.extract_strided_slice %28 {offsets = [0, 0, 0], sizes = [8, 16, 8], strides = [1, 1, 1]} : vector<8x18x8xf32> to vector<8x16x8xf32>
    %30 = vector.extract_strided_slice %28 {offsets = [0, 1, 0], sizes = [8, 16, 8], strides = [1, 1, 1]} : vector<8x18x8xf32> to vector<8x16x8xf32>
    %31 = vector.extract_strided_slice %28 {offsets = [0, 2, 0], sizes = [8, 16, 8], strides = [1, 1, 1]} : vector<8x18x8xf32> to vector<8x16x8xf32>
    %32 = tpu.concatenate %29, %30, %31 in 2 : vector<8x16x8xf32>, vector<8x16x8xf32>, vector<8x16x8xf32> -> vector<8x16x24xf32>
    %33 = vector.shape_cast %32 : vector<8x16x24xf32> to vector<128x24xf32>
    %c2 = arith.constant 2 : index
    %c0_15 = arith.constant 0 : index
    %c0_16 = arith.constant 0 : index
    %34 = vector.load %arg4[%c2, %c0_15, %c0_16] : memref<3x24x8xf32, #tpu.memory_space<vmem>>, vector<1x24x8xf32>
    %35 = vector.shape_cast %34 : vector<1x24x8xf32> to vector<24x8xf32>
    %cst_17 = arith.constant dense<0.000000e+00> : vector<128x8xf32>
    %36 = tpu.matmul %33, %35, %cst_17 {dimension_numbers = #tpu.dot_dimension_numbers<[1], [0], [0], [1], [0, 0, 1, 1], [], []>} : vector<128x24xf32>, vector<24x8xf32>, vector<128x8xf32> -> vector<128x8xf32>
    %37 = arith.addf %27, %36 : vector<128x8xf32>
    %38 = vector.shape_cast %37 : vector<128x8xf32> to vector<8x16x8xf32>
    %39 = vector.shape_cast %38 : vector<8x16x8xf32> to vector<1x8x16x8xf32>
    %c0_18 = arith.constant 0 : index
    %c0_19 = arith.constant 0 : index
    %c0_20 = arith.constant 0 : index
    %c0_21 = arith.constant 0 : index
    %40 = vector.load %arg7[%c0_18, %c0_19, %c0_20, %c0_21] : memref<1x8x16x8xf32, #tpu.memory_space<vmem>>, vector<1x8x16x8xf32>
    tpu.vector_store %arg7[%c0_18, %c0_19, %c0_20, %c0_21], %39 {strides = array<i32>} : memref<1x8x16x8xf32, #tpu.memory_space<vmem>>, vector<1x8x16x8xf32>,
    %cst_22 = arith.constant dense<0.000000e+00> : vector<16x8xf32>
    %41 = vector.multi_reduction <add>, %38, %cst_22 [0] : vector<8x16x8xf32> to vector<16x8xf32>
    %cst_23 = arith.constant dense<0.000000e+00> : vector<8xf32>
    %42 = vector.multi_reduction <add>, %41, %cst_23 [0] : vector<16x8xf32> to vector<8xf32>
    %43 = vector.shape_cast %42 : vector<8xf32> to vector<1x8xf32>
    %cst_24 = arith.constant 7.812500e-03 : f32
    %44 = vector.broadcast %cst_24 : f32 to vector<1x8xf32>
    %45 = arith.mulf %43, %44 : vector<1x8xf32>
    %46 = vector.shape_cast %45 : vector<1x8xf32> to vector<1x1x8xf32>
    %47 = vector.broadcast %46 : vector<1x1x8xf32> to vector<8x16x8xf32>
    %48 = arith.subf %38, %47 : vector<8x16x8xf32>
    %49 = arith.mulf %48, %48 : vector<8x16x8xf32>
    %cst_25 = arith.constant dense<0.000000e+00> : vector<16x8xf32>
    %50 = vector.multi_reduction <add>, %49, %cst_25 [0] : vector<8x16x8xf32> to vector<16x8xf32>
    %cst_26 = arith.constant dense<0.000000e+00> : vector<8xf32>
    %51 = vector.multi_reduction <add>, %50, %cst_26 [0] : vector<16x8xf32> to vector<8xf32>
    %52 = vector.shape_cast %51 : vector<8xf32> to vector<1x8xf32>
    %cst_27 = arith.constant 0.000000e+00 : f32
    %53 = vector.broadcast %cst_27 : f32 to vector<6x8xf32>
    %54 = tpu.concatenate %43, %52, %53 in 0 : vector<1x8xf32>, vector<1x8xf32>, vector<6x8xf32> -> vector<8x8xf32>
    %55 = vector.shape_cast %54 : vector<8x8xf32> to vector<1x1x8x8xf32>
    %c0_28 = arith.constant 0 : index
    %c0_29 = arith.constant 0 : index
    %c0_30 = arith.constant 0 : index
    %c0_31 = arith.constant 0 : index
    %56 = vector.load %arg8[%c0_28, %c0_29, %c0_30, %c0_31] : memref<1x1x8x8xf32, #tpu.memory_space<vmem>>, vector<1x1x8x8xf32>
    tpu.vector_store %arg8[%c0_28, %c0_29, %c0_30, %c0_31], %55 {strides = array<i32>} : memref<1x1x8x8xf32, #tpu.memory_space<vmem>>, vector<1x1x8x8xf32>,
    return
  }
  func.func @transform_0(%arg0: i32, %arg1: i32) -> (i32, i32, i32, i32) {
    %c0_i32 = arith.constant 0 : i32
    %c0_i32_0 = arith.constant 0 : i32
    %c0_i32_1 = arith.constant 0 : i32
    return %arg0, %arg1, %c0_i32, %c0_i32_0 : i32, i32, i32, i32
  }
  func.func @transform_1(%arg0: i32, %arg1: i32) -> (i32, i32, i32, i32, i32) {
    %c0_i32 = arith.constant 0 : i32
    %c0_i32_0 = arith.constant 0 : i32
    %c0_i32_1 = arith.constant 0 : i32
    %c0_i32_2 = arith.constant 0 : i32
    return %arg0, %arg1, %c0_i32, %c0_i32_0, %c0_i32_1 : i32, i32, i32, i32, i32
  }
  func.func @transform_2(%arg0: i32, %arg1: i32) -> (i32, i32, i32) {
    %c0_i32 = arith.constant 0 : i32
    %c0_i32_0 = arith.constant 0 : i32
    %c0_i32_1 = arith.constant 0 : i32
    %c0_i32_2 = arith.constant 0 : i32
    return %c0_i32, %c0_i32_0, %c0_i32_1 : i32, i32, i32
  }
  func.func @transform_3(%arg0: i32, %arg1: i32) -> (i32, i32) {
    %c0_i32 = arith.constant 0 : i32
    %c0_i32_0 = arith.constant 0 : i32
    %c0_i32_1 = arith.constant 0 : i32
    return %c0_i32, %c0_i32_0 : i32, i32
  }
  func.func @transform_4(%arg0: i32, %arg1: i32) -> (i32, i32) {
    %c0_i32 = arith.constant 0 : i32
    %c0_i32_0 = arith.constant 0 : i32
    %c0_i32_1 = arith.constant 0 : i32
    return %c0_i32, %c0_i32_0 : i32, i32
  }
  func.func @transform_5(%arg0: i32, %arg1: i32) -> (i32, i32, i32, i32) {
    %c0_i32 = arith.constant 0 : i32
    %c0_i32_0 = arith.constant 0 : i32
    %c0_i32_1 = arith.constant 0 : i32
    return %arg0, %arg1, %c0_i32, %c0_i32_0 : i32, i32, i32, i32
  }
  func.func @transform_6(%arg0: i32, %arg1: i32) -> (i32, i32, i32, i32) {
    %c0_i32 = arith.constant 0 : i32
    %c0_i32_0 = arith.constant 0 : i32
    %c0_i32_1 = arith.constant 0 : i32
    return %arg0, %arg1, %c0_i32, %c0_i32_0 : i32, i32, i32, i32
  }
}

module attributes {stable_mosaic.version = 11 : i64} {
  func.func @_conv3x3_kernel(%arg0: i32, %arg1: i32, %arg2: memref<1x8x16x8xf32, #tpu.memory_space<vmem>>, %arg3: memref<1x1x2x16x8xf32, #tpu.memory_space<vmem>>, %arg4: memref<3x24x8xf32, #tpu.memory_space<vmem>>, %arg5: memref<1x8xf32, #tpu.memory_space<vmem>>, %arg6: memref<1x8xf32, #tpu.memory_space<vmem>>, %arg7: memref<1x8x16x8xf32, #tpu.memory_space<vmem>>, %arg8: memref<1x1x8x8xf32, #tpu.memory_space<vmem>>) attributes {dimension_semantics = [#tpu.dimension_semantics<parallel>, #tpu.dimension_semantics<parallel>], iteration_bounds = array<i64: 2, 2>, scalar_prefetch = 0 : i64, scratch_operands = 0 : i64, tpu.core_type = #tpu.core_type<tc>, window_params = [{transform_indices = @transform_0, window_bounds = array<i64: 1, 8, 16, 8>}, {transform_indices = @transform_1, window_bounds = array<i64: 1, 1, 2, 16, 8>}, {pipeline_mode = #tpu.pipeline_mode<synchronous>, transform_indices = @transform_2, window_bounds = array<i64: 3, 24, 8>}, {pipeline_mode = #tpu.pipeline_mode<synchronous>, transform_indices = @transform_3, window_bounds = array<i64: 1, 8>}, {pipeline_mode = #tpu.pipeline_mode<synchronous>, transform_indices = @transform_4, window_bounds = array<i64: 1, 8>}, {transform_indices = @transform_5, window_bounds = array<i64: 1, 8, 16, 8>}, {transform_indices = @transform_6, window_bounds = array<i64: 1, 1, 8, 8>}]} {
    %c0 = arith.constant 0 : index
    %c0_0 = arith.constant 0 : index
    %c0_1 = arith.constant 0 : index
    %c0_2 = arith.constant 0 : index
    %0 = vector.load %arg2[%c0, %c0_0, %c0_1, %c0_2] : memref<1x8x16x8xf32, #tpu.memory_space<vmem>>, vector<1x8x16x8xf32>
    %1 = vector.shape_cast %0 : vector<1x8x16x8xf32> to vector<8x16x8xf32>
    %c0_3 = arith.constant 0 : index
    %c0_4 = arith.constant 0 : index
    %c0_5 = arith.constant 0 : index
    %c0_6 = arith.constant 0 : index
    %c0_7 = arith.constant 0 : index
    %2 = vector.load %arg3[%c0_3, %c0_4, %c0_5, %c0_6, %c0_7] : memref<1x1x2x16x8xf32, #tpu.memory_space<vmem>>, vector<1x1x2x16x8xf32>
    %3 = vector.shape_cast %2 : vector<1x1x2x16x8xf32> to vector<2x16x8xf32>
    %4 = vector.extract_strided_slice %3 {offsets = [0, 0, 0], sizes = [1, 16, 8], strides = [1, 1, 1]} : vector<2x16x8xf32> to vector<1x16x8xf32>
    %5 = vector.extract_strided_slice %3 {offsets = [1, 0, 0], sizes = [1, 16, 8], strides = [1, 1, 1]} : vector<2x16x8xf32> to vector<1x16x8xf32>
    %c0_8 = arith.constant 0 : index
    %c0_9 = arith.constant 0 : index
    %6 = vector.load %arg5[%c0_8, %c0_9] : memref<1x8xf32, #tpu.memory_space<vmem>>, vector<1x8xf32>
    %c0_10 = arith.constant 0 : index
    %c0_11 = arith.constant 0 : index
    %7 = vector.load %arg6[%c0_10, %c0_11] : memref<1x8xf32, #tpu.memory_space<vmem>>, vector<1x8xf32>
    %8 = vector.shape_cast %6 : vector<1x8xf32> to vector<1x1x8xf32>
    %9 = vector.broadcast %8 : vector<1x1x8xf32> to vector<8x16x8xf32>
    %10 = arith.mulf %1, %9 : vector<8x16x8xf32>
    %11 = vector.shape_cast %7 : vector<1x8xf32> to vector<1x1x8xf32>
    %12 = vector.broadcast %11 : vector<1x1x8xf32> to vector<8x16x8xf32>
    %13 = arith.addf %10, %12 : vector<8x16x8xf32>
    %cst = arith.constant 0.000000e+00 : f32
    %14 = vector.broadcast %cst : f32 to vector<8x16x8xf32>
    %15 = arith.maximumf %13, %14 : vector<8x16x8xf32>
    %16 = vector.shape_cast %6 : vector<1x8xf32> to vector<1x1x8xf32>
    %17 = vector.broadcast %16 : vector<1x1x8xf32> to vector<1x16x8xf32>
    %18 = arith.mulf %4, %17 : vector<1x16x8xf32>
    %19 = vector.shape_cast %7 : vector<1x8xf32> to vector<1x1x8xf32>
    %20 = vector.broadcast %19 : vector<1x1x8xf32> to vector<1x16x8xf32>
    %21 = arith.addf %18, %20 : vector<1x16x8xf32>
    %cst_12 = arith.constant 0.000000e+00 : f32
    %22 = vector.broadcast %cst_12 : f32 to vector<1x16x8xf32>
    %23 = arith.maximumf %21, %22 : vector<1x16x8xf32>
    %c0_i32 = arith.constant 0 : i32
    %24 = arith.cmpi sgt, %arg1, %c0_i32 : i32
    %cst_13 = arith.constant 1.000000e+00 : f32
    %cst_14 = arith.constant 0.000000e+00 : f32
    %25 = arith.select %24, %cst_13, %cst_14 : f32
    %26 = vector.broadcast %25 : f32 to vector<1x16x8xf32>
    %27 = arith.mulf %23, %26 : vector<1x16x8xf32>
    %28 = vector.shape_cast %6 : vector<1x8xf32> to vector<1x1x8xf32>
    %29 = vector.broadcast %28 : vector<1x1x8xf32> to vector<1x16x8xf32>
    %30 = arith.mulf %5, %29 : vector<1x16x8xf32>
    %31 = vector.shape_cast %7 : vector<1x8xf32> to vector<1x1x8xf32>
    %32 = vector.broadcast %31 : vector<1x1x8xf32> to vector<1x16x8xf32>
    %33 = arith.addf %30, %32 : vector<1x16x8xf32>
    %cst_15 = arith.constant 0.000000e+00 : f32
    %34 = vector.broadcast %cst_15 : f32 to vector<1x16x8xf32>
    %35 = arith.maximumf %33, %34 : vector<1x16x8xf32>
    %c1_i32 = arith.constant 1 : i32
    %36 = arith.cmpi slt, %arg1, %c1_i32 : i32
    %cst_16 = arith.constant 1.000000e+00 : f32
    %cst_17 = arith.constant 0.000000e+00 : f32
    %37 = arith.select %36, %cst_16, %cst_17 : f32
    %38 = vector.broadcast %37 : f32 to vector<1x16x8xf32>
    %39 = arith.mulf %35, %38 : vector<1x16x8xf32>
    %40 = tpu.concatenate %27, %15, %39 in 0 : vector<1x16x8xf32>, vector<8x16x8xf32>, vector<1x16x8xf32> -> vector<10x16x8xf32>
    %cst_18 = arith.constant 0.000000e+00 : f32
    %41 = vector.broadcast %cst_18 : f32 to vector<10x1x8xf32>
    %42 = tpu.concatenate %41, %40, %41 in 1 : vector<10x1x8xf32>, vector<10x16x8xf32>, vector<10x1x8xf32> -> vector<10x18x8xf32>
    %43 = vector.extract_strided_slice %42 {offsets = [0, 0, 0], sizes = [8, 18, 8], strides = [1, 1, 1]} : vector<10x18x8xf32> to vector<8x18x8xf32>
    %44 = vector.extract_strided_slice %43 {offsets = [0, 0, 0], sizes = [8, 16, 8], strides = [1, 1, 1]} : vector<8x18x8xf32> to vector<8x16x8xf32>
    %45 = vector.extract_strided_slice %43 {offsets = [0, 1, 0], sizes = [8, 16, 8], strides = [1, 1, 1]} : vector<8x18x8xf32> to vector<8x16x8xf32>
    %46 = vector.extract_strided_slice %43 {offsets = [0, 2, 0], sizes = [8, 16, 8], strides = [1, 1, 1]} : vector<8x18x8xf32> to vector<8x16x8xf32>
    %47 = tpu.concatenate %44, %45, %46 in 2 : vector<8x16x8xf32>, vector<8x16x8xf32>, vector<8x16x8xf32> -> vector<8x16x24xf32>
    %48 = vector.shape_cast %47 : vector<8x16x24xf32> to vector<128x24xf32>
    %c0_19 = arith.constant 0 : index
    %c0_20 = arith.constant 0 : index
    %c0_21 = arith.constant 0 : index
    %49 = vector.load %arg4[%c0_19, %c0_20, %c0_21] : memref<3x24x8xf32, #tpu.memory_space<vmem>>, vector<1x24x8xf32>
    %50 = vector.shape_cast %49 : vector<1x24x8xf32> to vector<24x8xf32>
    %cst_22 = arith.constant dense<0.000000e+00> : vector<128x8xf32>
    %51 = tpu.matmul %48, %50, %cst_22 {dimension_numbers = #tpu.dot_dimension_numbers<[1], [0], [0], [1], [0, 0, 1, 1], [], []>} : vector<128x24xf32>, vector<24x8xf32>, vector<128x8xf32> -> vector<128x8xf32>
    %52 = vector.extract_strided_slice %42 {offsets = [1, 0, 0], sizes = [8, 18, 8], strides = [1, 1, 1]} : vector<10x18x8xf32> to vector<8x18x8xf32>
    %53 = vector.extract_strided_slice %52 {offsets = [0, 0, 0], sizes = [8, 16, 8], strides = [1, 1, 1]} : vector<8x18x8xf32> to vector<8x16x8xf32>
    %54 = vector.extract_strided_slice %52 {offsets = [0, 1, 0], sizes = [8, 16, 8], strides = [1, 1, 1]} : vector<8x18x8xf32> to vector<8x16x8xf32>
    %55 = vector.extract_strided_slice %52 {offsets = [0, 2, 0], sizes = [8, 16, 8], strides = [1, 1, 1]} : vector<8x18x8xf32> to vector<8x16x8xf32>
    %56 = tpu.concatenate %53, %54, %55 in 2 : vector<8x16x8xf32>, vector<8x16x8xf32>, vector<8x16x8xf32> -> vector<8x16x24xf32>
    %57 = vector.shape_cast %56 : vector<8x16x24xf32> to vector<128x24xf32>
    %c1 = arith.constant 1 : index
    %c0_23 = arith.constant 0 : index
    %c0_24 = arith.constant 0 : index
    %58 = vector.load %arg4[%c1, %c0_23, %c0_24] : memref<3x24x8xf32, #tpu.memory_space<vmem>>, vector<1x24x8xf32>
    %59 = vector.shape_cast %58 : vector<1x24x8xf32> to vector<24x8xf32>
    %cst_25 = arith.constant dense<0.000000e+00> : vector<128x8xf32>
    %60 = tpu.matmul %57, %59, %cst_25 {dimension_numbers = #tpu.dot_dimension_numbers<[1], [0], [0], [1], [0, 0, 1, 1], [], []>} : vector<128x24xf32>, vector<24x8xf32>, vector<128x8xf32> -> vector<128x8xf32>
    %61 = arith.addf %51, %60 : vector<128x8xf32>
    %62 = vector.extract_strided_slice %42 {offsets = [2, 0, 0], sizes = [8, 18, 8], strides = [1, 1, 1]} : vector<10x18x8xf32> to vector<8x18x8xf32>
    %63 = vector.extract_strided_slice %62 {offsets = [0, 0, 0], sizes = [8, 16, 8], strides = [1, 1, 1]} : vector<8x18x8xf32> to vector<8x16x8xf32>
    %64 = vector.extract_strided_slice %62 {offsets = [0, 1, 0], sizes = [8, 16, 8], strides = [1, 1, 1]} : vector<8x18x8xf32> to vector<8x16x8xf32>
    %65 = vector.extract_strided_slice %62 {offsets = [0, 2, 0], sizes = [8, 16, 8], strides = [1, 1, 1]} : vector<8x18x8xf32> to vector<8x16x8xf32>
    %66 = tpu.concatenate %63, %64, %65 in 2 : vector<8x16x8xf32>, vector<8x16x8xf32>, vector<8x16x8xf32> -> vector<8x16x24xf32>
    %67 = vector.shape_cast %66 : vector<8x16x24xf32> to vector<128x24xf32>
    %c2 = arith.constant 2 : index
    %c0_26 = arith.constant 0 : index
    %c0_27 = arith.constant 0 : index
    %68 = vector.load %arg4[%c2, %c0_26, %c0_27] : memref<3x24x8xf32, #tpu.memory_space<vmem>>, vector<1x24x8xf32>
    %69 = vector.shape_cast %68 : vector<1x24x8xf32> to vector<24x8xf32>
    %cst_28 = arith.constant dense<0.000000e+00> : vector<128x8xf32>
    %70 = tpu.matmul %67, %69, %cst_28 {dimension_numbers = #tpu.dot_dimension_numbers<[1], [0], [0], [1], [0, 0, 1, 1], [], []>} : vector<128x24xf32>, vector<24x8xf32>, vector<128x8xf32> -> vector<128x8xf32>
    %71 = arith.addf %61, %70 : vector<128x8xf32>
    %72 = vector.shape_cast %71 : vector<128x8xf32> to vector<8x16x8xf32>
    %73 = vector.shape_cast %72 : vector<8x16x8xf32> to vector<1x8x16x8xf32>
    %c0_29 = arith.constant 0 : index
    %c0_30 = arith.constant 0 : index
    %c0_31 = arith.constant 0 : index
    %c0_32 = arith.constant 0 : index
    %74 = vector.load %arg7[%c0_29, %c0_30, %c0_31, %c0_32] : memref<1x8x16x8xf32, #tpu.memory_space<vmem>>, vector<1x8x16x8xf32>
    tpu.vector_store %arg7[%c0_29, %c0_30, %c0_31, %c0_32], %73 {strides = array<i32>} : memref<1x8x16x8xf32, #tpu.memory_space<vmem>>, vector<1x8x16x8xf32>,
    %cst_33 = arith.constant dense<0.000000e+00> : vector<16x8xf32>
    %75 = vector.multi_reduction <add>, %72, %cst_33 [0] : vector<8x16x8xf32> to vector<16x8xf32>
    %cst_34 = arith.constant dense<0.000000e+00> : vector<8xf32>
    %76 = vector.multi_reduction <add>, %75, %cst_34 [0] : vector<16x8xf32> to vector<8xf32>
    %77 = vector.shape_cast %76 : vector<8xf32> to vector<1x8xf32>
    %cst_35 = arith.constant 7.812500e-03 : f32
    %78 = vector.broadcast %cst_35 : f32 to vector<1x8xf32>
    %79 = arith.mulf %77, %78 : vector<1x8xf32>
    %80 = vector.shape_cast %79 : vector<1x8xf32> to vector<1x1x8xf32>
    %81 = vector.broadcast %80 : vector<1x1x8xf32> to vector<8x16x8xf32>
    %82 = arith.subf %72, %81 : vector<8x16x8xf32>
    %83 = arith.mulf %82, %82 : vector<8x16x8xf32>
    %cst_36 = arith.constant dense<0.000000e+00> : vector<16x8xf32>
    %84 = vector.multi_reduction <add>, %83, %cst_36 [0] : vector<8x16x8xf32> to vector<16x8xf32>
    %cst_37 = arith.constant dense<0.000000e+00> : vector<8xf32>
    %85 = vector.multi_reduction <add>, %84, %cst_37 [0] : vector<16x8xf32> to vector<8xf32>
    %86 = vector.shape_cast %85 : vector<8xf32> to vector<1x8xf32>
    %cst_38 = arith.constant 0.000000e+00 : f32
    %87 = vector.broadcast %cst_38 : f32 to vector<6x8xf32>
    %88 = tpu.concatenate %77, %86, %87 in 0 : vector<1x8xf32>, vector<1x8xf32>, vector<6x8xf32> -> vector<8x8xf32>
    %89 = vector.shape_cast %88 : vector<8x8xf32> to vector<1x1x8x8xf32>
    %c0_39 = arith.constant 0 : index
    %c0_40 = arith.constant 0 : index
    %c0_41 = arith.constant 0 : index
    %c0_42 = arith.constant 0 : index
    %90 = vector.load %arg8[%c0_39, %c0_40, %c0_41, %c0_42] : memref<1x1x8x8xf32, #tpu.memory_space<vmem>>, vector<1x1x8x8xf32>
    tpu.vector_store %arg8[%c0_39, %c0_40, %c0_41, %c0_42], %89 {strides = array<i32>} : memref<1x1x8x8xf32, #tpu.memory_space<vmem>>, vector<1x1x8x8xf32>,
    return
  }
  func.func @transform_0(%arg0: i32, %arg1: i32) -> (i32, i32, i32, i32) {
    %c0_i32 = arith.constant 0 : i32
    %c0_i32_0 = arith.constant 0 : i32
    %c0_i32_1 = arith.constant 0 : i32
    return %arg0, %arg1, %c0_i32, %c0_i32_0 : i32, i32, i32, i32
  }
  func.func @transform_1(%arg0: i32, %arg1: i32) -> (i32, i32, i32, i32, i32) {
    %c0_i32 = arith.constant 0 : i32
    %c0_i32_0 = arith.constant 0 : i32
    %c0_i32_1 = arith.constant 0 : i32
    %c0_i32_2 = arith.constant 0 : i32
    return %arg0, %arg1, %c0_i32, %c0_i32_0, %c0_i32_1 : i32, i32, i32, i32, i32
  }
  func.func @transform_2(%arg0: i32, %arg1: i32) -> (i32, i32, i32) {
    %c0_i32 = arith.constant 0 : i32
    %c0_i32_0 = arith.constant 0 : i32
    %c0_i32_1 = arith.constant 0 : i32
    %c0_i32_2 = arith.constant 0 : i32
    return %c0_i32, %c0_i32_0, %c0_i32_1 : i32, i32, i32
  }
  func.func @transform_3(%arg0: i32, %arg1: i32) -> (i32, i32) {
    %c0_i32 = arith.constant 0 : i32
    %c0_i32_0 = arith.constant 0 : i32
    %c0_i32_1 = arith.constant 0 : i32
    return %c0_i32, %c0_i32_0 : i32, i32
  }
  func.func @transform_4(%arg0: i32, %arg1: i32) -> (i32, i32) {
    %c0_i32 = arith.constant 0 : i32
    %c0_i32_0 = arith.constant 0 : i32
    %c0_i32_1 = arith.constant 0 : i32
    return %c0_i32, %c0_i32_0 : i32, i32
  }
  func.func @transform_5(%arg0: i32, %arg1: i32) -> (i32, i32, i32, i32) {
    %c0_i32 = arith.constant 0 : i32
    %c0_i32_0 = arith.constant 0 : i32
    %c0_i32_1 = arith.constant 0 : i32
    return %arg0, %arg1, %c0_i32, %c0_i32_0 : i32, i32, i32, i32
  }
  func.func @transform_6(%arg0: i32, %arg1: i32) -> (i32, i32, i32, i32) {
    %c0_i32 = arith.constant 0 : i32
    %c0_i32_0 = arith.constant 0 : i32
    %c0_i32_1 = arith.constant 0 : i32
    return %arg0, %arg1, %c0_i32, %c0_i32_0 : i32, i32, i32, i32
  }
}

</mosaic_0001>

<bundles_post_ra>
// kernel: double_conv.3
= control target key start
LH: loop header
LB: loop body
LE: loop exit
PB: predicated region body
PF: predicated region fallthrough
CT: control target
= control target key end

     0   :  { %s1619_s21 = smov 0   ;;  %s1621_s22 = smov 0   ;;  %s2281_s0 = inlined_call_operand.vmem [shape: f32[2,16,16,8], index: 0, kind: input, shape index: {}]   ;;  %s2282_s1 = inlined_call_operand.vmem [shape: f32[2,2,2,16,8], index: 1, kind: input, shape index: {}]   ;;  %s2283_s2 = inlined_call_operand.vmem [shape: f32[3,24,8], index: 2, kind: input, shape index: {}]   ;;  %s2284_s3 = inlined_call_operand.vmem [shape: f32[1,8], index: 3, kind: input, shape index: {}]   ;;  %s2285_s4 = inlined_call_operand.vmem [shape: f32[1,8], index: 4, kind: input, shape index: {}]   ;;  %s2286_s5 = inlined_call_operand.vmem [shape: f32[2,16,16,8], index: 5, kind: output, shape index: {0}]   ;;  %s2287_s6 = inlined_call_operand.vmem [shape: f32[2,2,8,8], index: 6, kind: output, shape index: {1}]  }
   0x1   :  { %s1623_s23 = smov 0   ;;  %s1625_s24 = smov 0  }
   0x2   :  { %s1627_s25 = smov 0  }
   0x3 LB: > { %s26_s26 = sadd.s32 1, %s1572_s23  ;;  %s29_s27 = sadd.s32 1, %s1576_s24  ;;  %s1580_s25 = sphi %s1627_s25, %s17_s25   ;;  %s1576_s24 = sphi %s1625_s24, %s2291_s24   ;;  %s1572_s23 = sphi %s1623_s23, %s2290_s23   ;;  %s1568_s22 = sphi %s1621_s22, %s2289_s22   ;;  %s1564_s21 = sphi %s1619_s21, %s2288_s21  }
   0x4   : > { %p27_p0 = scmp.ge.s32.totalorder %s26_s26, 2  ;;  %p1419_p1 = scmp.ge.s32.totalorder %s1580_s25, 1 }
   0x5   : > { %p255_p2 = scmp.lt.s32.totalorder %s1580_s25, 5 }
   0x6   : > { %s2293_s26 = smov (%p27_p0, %s26_s26), 0  ;;  %s2295_s27 = smov (!%p27_p0, %s29_s27), %s1576_s24 }
   0x7   : > { %p256_p3 = pnand %p1419_p1, %p255_p2  ;;  %p31_p4 = scmp.ge.s32.totalorder %s2295_s27, 2 }
   0x8   : > { %s1420_s28 = sshll.u32 (!%p256_p3), %s1564_s21, 3  ;;  %p313_p5 = scmp.lt.s32.totalorder (!%p256_p3), %s1568_s22, 1 }
   0x9   : > { %s2297_s27 = smov (%p31_p4, %s2295_s27), 0  ;;  %259 = sbr.rel (%p256_p3) target bundleno = 473 (0x1d9), region = 40 }
   0xa   : > { %p315_p6 = scmp.lt.s32.totalorder (!%p256_p3), %s1420_s28, 15  ;;  %p325_p7 = scmp.lt.s32.totalorder (!%p256_p3), %s1564_s21, 1 }
   0xb   : > { %p433_p8 = scmp.gt.s32.totalorder (!%p256_p3), %s1564_s21, 0  ;;  %s1582_s9 = smov (!%p256_p3), 8  }
   0xc   : > { %s1583_s11 = smov (!%p256_p3), 16  }
   0xe   : > { %s2299_s22 = smov (!%p313_p5, %s1568_s22), 1  ;;  %s2301_s28 = smov (!%p315_p6, %s1420_s28), 15  ;;  %v1660_v0 = vld [vmem:[%s2284_s3] ss:$0 sm:$0xff]  ;;  %vm469_vm0 = vcmask 1040384   ;;  %vm566_vm1 = vcmask 1046528  }
   0xf   : > { %s1422_s29 = sshll.u32 %s2299_s22, 5  ;;  %s1421_s30 = sshll.u32 %s2301_s28, 1  ;;  %v1674_v1 = vld [vmem:[%s2285_s4] ss:$0 sm:$0xff]  ;;  %vm655_vm2 = vcmask 1045504   ;;  %vm744_vm3 = vcmask 64512  }
  0x10   : > { %s1655_s7 = sadd.s32 %s1422_s29, %s1421_s30  ;;  %s1425_s16 = sshll.u32 %s2299_s22, 3  ;;  %vm761_vm4 = vcmask 130048   ;;  %vm813_vm5 = vcmask 195584   ;;  %vm1245_vm6 = vcmask 1041408  }
  0x11   : > { %s1423_s10 = sshll.u32 %s1655_s7, 3  ;;  %s1431_s7 = sshll.u32 %s2299_s22, 1 }
  0x12   : > { %s1669_s13 = scalar_lea.vmem %s2281_s0, %s1423_s10 }
  0x13   : > { %v353_v2 = vld [vmem:[%s1669_s13 + $0x10] sm:$0xff]  ;;  %v354_v3 = vld [vmem:[%s1669_s13 + $0x18] sm:$0xff]  ;;  %v351_v4 = vld [vmem:[%s1669_s13] sm:$0xff]  ;;  %s1683_s17 = scalar_select %p325_p7, %s1564_s21, 1 }
  0x14   : > { %v378_v5 = vmul.f32 %v1660_v0, %v353_v2  ;;  %v379_v6 = vmul.f32 %v1660_v0, %v354_v3  ;;  %v352_v7 = vld [vmem:[%s1669_s13 + $0x8] sm:$0xff]  ;;  %v376_v8 = vmul.f32 %v1660_v0, %v351_v4  ;;  %v363_v9 = vld [vmem:[%s1669_s13 + $0x60] sm:$0xff]  ;;  %s434_s8 = scalar_select %p433_p8, 1.0, 0.0 }
  0x15   : > { %v364_v10 = vld [vmem:[%s1669_s13 + $0x68] sm:$0xff]  ;;  %v377_v11 = vmul.f32 %v1660_v0, %v352_v7  ;;  %v388_v12 = vmul.f32 %v1660_v0, %v363_v9  ;;  %s1424_s18 = sshll.u32 %s1683_s17, 2 }
  0x16   : > { %v389_v13 = vmul.f32 %v1660_v0, %v364_v10  ;;  %v397_v14 = vadd.f32 %v1674_v1, %v378_v5  ;;  %v398_v15 = vadd.f32 %v1674_v1, %v379_v6  ;;  %v395_v16 = vadd.f32 %v1674_v1, %v376_v8  ;;  %s329_s19 = sadd.s32 %s1425_s16, %s1424_s18  ;;  %s2117_s18 = scalar_lea.vmem %s2286_s5, %s1423_s10 }
  0x17   : > { %v396_v17 = vadd.f32 %v1674_v1, %v377_v11  ;;  %v407_v18 = vadd.f32 %v1674_v1, %v388_v12  ;;  %s1426_s20 = sshll.u32 %s329_s19, 3  ;;  %v435_v51 = vstv %s434_s8  ;;  %s348_s10 = sadd.s32 %s1431_s7, %s1683_s17 }
  0x18   : > { %v408_v19 = vadd.f32 %v1674_v1, %v389_v13  ;;  %v413_v20 = vmax.f32 %v397_v14, 0.0  ;;  %v414_v21 = vmax.f32 %v398_v15, 0.0  ;;  %v411_v22 = vmax.f32 %v395_v16, 0.0  ;;  %s1704_s30 = scalar_lea.vmem %s2282_s1, %s1426_s20  ;;  %v355_v15 = vld [vmem:[%s1669_s13 + $0x20] sm:$0xff]  ;;  %v356_v16 = vld [vmem:[%s1669_s13 + $0x28] sm:$0xff]  ;;  %s1432_s19 = sshll.u32 %s348_s10, 3 }
  0x19   : > { %v412_v23 = vmax.f32 %v396_v17, 0.0  ;;  %v423_v24 = vmax.f32 %v407_v18, 0.0  ;;  %v367_v26 = vld [vmem:[%s1704_s30] sm:$0xff]  ;;  %v368_v27 = vld [vmem:[%s1704_s30 + $0x8] sm:$0xff]  ;;  %s445_s12 = scalar_select %p325_p7, 1.0, 0.0 }
  0x1a   : > { %v424_v25 = vmax.f32 %v408_v19, 0.0  ;;  %v476_v28 = vrot.slane %v413_v20, 7  ;;  %v477_v29 = vrot.slane %v414_v21, 7  ;;  %v473_v30 = vrot.slane %v411_v22, 7  ;;  %s350_s29 = scalar_lea.vmem %s2287_s6, %s1432_s19 }
  0x1b   : > { %v427_v31 = vmul.f32 %v1660_v0, %v367_v26  ;;  %v1710_v32 = vrot.slane %v412_v23, 7  ;;  %v491_v33 = vrot.slane %v423_v24, 7  ;;  %v428_v35 = vmul.f32 %v1660_v0, %v368_v27  ;;  %v365_v26 = vld [vmem:[%s1669_s13 + $0x70] sm:$0xff] }
  0x1c   : > { %v1712_v34 = vrot.slane %v424_v25, 7  ;;  %v1716_v36 = vsel %vm469_vm0, %v476_v28, %v477_v29  ;;  %v1719_v37 = vsel %vm469_vm0, 0.0, %v476_v28  ;;  %v1722_v38 = vsel %vm469_vm0, 0.0, %v473_v30 }
  0x1d   : > { %v429_v39 = vadd.f32 %v1674_v1, %v427_v31  ;;  %v577_v40 = vrot.slane %v1719_v37, 1  ;;  %v578_v41 = vrot.slane %v1716_v36, 1  ;;  %v1731_v42 = vsel %vm469_vm0, %v473_v30, %v1710_v32 }
  0x1e   : > { %v572_v43 = vrot.slane %v1722_v38, 1  ;;  %v573_v44 = vrot.slane %v1731_v42, 1  ;;  %v1737_v45 = vsel %vm469_vm0, %v491_v33, %v1712_v34  ;;  %v1741_v47 = vsel %vm469_vm0, 0.0, %v491_v33 }
  0x1f   : > { %v579_v46 = vsel %vm566_vm1, %v577_v40, %v578_v41  ;;  %v603_v48 = vrot.slane %v1737_v45, 1  ;;  %v602_v50 = vrot.slane %v1741_v47, 1  ;;  %v666_v52 = vrot.slane %v1719_v37, 2 }
  0x20   : > { %615 = vrot.lane.b32.xlu0 %v579_v46, %s1582_s9  ;;  %v574_v49 = vsel %vm566_vm1, %v572_v43, %v573_v44  ;;  %v667_v53 = vrot.slane %v1716_v36, 2  ;;  %v430_v54 = vadd.f32 %v1674_v1, %v428_v35  ;;  %v431_v55 = vmax.f32 %v429_v39, 0.0 }
  0x21   : > { %611 = vrot.lane.b32.xlu1 %v574_v49, %s1582_s9  ;;  %v691_v56 = vrot.slane %v1741_v47, 2  ;;  %v692_v57 = vrot.slane %v1737_v45, 2  ;;  %v604_v58 = vsel %vm566_vm1, %v602_v50, %v603_v48  ;;  %v542_v59 = vsel %vm469_vm0, %v477_v29, 0.0  ;;  %v366_v29 = vld [vmem:[%s1669_s13 + $0x78] sm:$0xff] }
  0x22   : > { %635 = vrot.lane.b32.xlu2 %v604_v58, %s1582_s9  ;;  %v432_v60 = vmax.f32 %v430_v54, 0.0  ;;  %v436_v61 = vmul.f32 %v435_v51, %v431_v55  ;;  %v580_v62 = vrot.slane %v542_v59, 1  ;;  %v668_v63 = vsel %vm655_vm2, %v666_v52, %v667_v53 }
  0x23   : > { %v693_v4 = vsel %vm655_vm2, %v691_v56, %v692_v57  ;;  %v661_v8 = vrot.slane %v1722_v38, 2  ;;  %v662_v9 = vrot.slane %v1731_v42, 2  ;;  %v380_v20 = vmul.f32 %v1660_v0, %v355_v15 }
  0x24   : > { %v437_v2 = vmul.f32 %v435_v51, %v432_v60  ;;  %v470_v3 = vrot.slane %v436_v61, 7  ;;  %v581_v7 = vsel %vm566_vm1, %v578_v41, %v580_v62  ;;  %v381_v21 = vmul.f32 %v1660_v0, %v356_v16 }
  0x25   : > { %v663_v17 = vsel %vm655_vm2, %v661_v8, %v662_v9  ;;  %v669_v23 = vrot.slane %v542_v59, 2  ;;  %v541_v24 = vsel %vm469_vm0, %v1710_v32, 0.0  ;;  %v399_v27 = vadd.f32 %v1674_v1, %v380_v20 }
  0x26   : > { %v471_v5 = vrot.slane %v437_v2, 7  ;;  %v1765_v6 = vsel %vm469_vm0, 0.0, %v470_v3  ;;  %v400_v28 = vadd.f32 %v1674_v1, %v381_v21  ;;  %v575_v30 = vrot.slane %v541_v24, 1 }
  0x27   : > { %v567_v11 = vrot.slane %v1765_v6, 1  ;;  %v656_v13 = vrot.slane %v1765_v6, 2  ;;  %v670_v31 = vsel %vm655_vm2, %v667_v53, %v669_v23  ;;  %v390_v33 = vmul.f32 %v1660_v0, %v365_v26 }
  0x28   : > { %704 = vrot.lane.b32.xlu0 %v668_v63, %s1583_s11  ;;  %v1773_v10 = vsel %vm469_vm0, %v470_v3, %v471_v5  ;;  %v540_v19 = vsel %vm469_vm0, %v471_v5, 0.0  ;;  %v547_v39 = vsel %vm469_vm0, %v1712_v34, 0.0  ;;  %v391_v32 = vmul.f32 %v1660_v0, %v366_v29  ;;  %v357_v3 = vld [vmem:[%s1669_s13 + $0x30] sm:$0xff] }
  0x29   : > { %724 = vrot.lane.b32.xlu1 %v693_v4, %s1583_s11  ;;  %v568_v12 = vrot.slane %v1773_v10, 1  ;;  %v657_v14 = vrot.slane %v1773_v10, 2  ;;  %v570_v25 = vrot.slane %v540_v19, 1  ;;  %v415_v40 = vmax.f32 %v399_v27, 0.0  ;;  %v358_v4 = vld [vmem:[%s1669_s13 + $0x38] sm:$0xff] }
  0x2a   : > { %617 = vrot.lane.b32.xlu2 %v581_v7, %s1582_s9  ;;  %v416_v41 = vmax.f32 %v400_v28, 0.0  ;;  %v576_v43 = vsel %vm566_vm1, %v573_v44, %v575_v30  ;;  %v605_v46 = vrot.slane %v547_v39, 1  ;;  %v409_v49 = vadd.f32 %v1674_v1, %v390_v33 }
  0x2b   : > { %v569_v18 = vsel %vm566_vm1, %v567_v11, %v568_v12  ;;  %v658_v22 = vsel %vm655_vm2, %v656_v13, %v657_v14  ;;  %v571_v35 = vsel %vm566_vm1, %v568_v12, %v570_v25  ;;  %v659_v50 = vrot.slane %v540_v19, 2 }
  0x2c   : > { %v410_v51 = vadd.f32 %v1674_v1, %v391_v32  ;;  %v479_v34 = vrot.slane %v415_v40, 7  ;;  %v480_v52 = vrot.slane %v416_v41, 7  ;;  %v664_v53 = vrot.slane %v541_v24, 2 }
  0x2d   : > { %v606_v54 = vsel %vm566_vm1, %v603_v48, %v605_v46  ;;  %v425_v44 = vmax.f32 %v409_v49, 0.0  ;;  %v660_v55 = vsel %vm655_vm2, %v657_v14, %v659_v50  ;;  %v694_v61 = vrot.slane %v547_v39, 2 }
  0x2e   : > { %v426_v56 = vmax.f32 %v410_v51, 0.0  ;;  %v1816_v58 = vsel %vm469_vm0, %v479_v34, %v480_v52  ;;  %v1819_v59 = vsel %vm469_vm0, 0.0, %v479_v34  ;;  %v665_v60 = vsel %vm655_vm2, %v662_v9, %v664_v53 }
  0x2f   : > { %v494_v62 = vrot.slane %v425_v44, 7  ;;  %v582_v48 = vrot.slane %v1819_v59, 1  ;;  %v583_v63 = vrot.slane %v1816_v58, 1  ;;  %v671_v5 = vrot.slane %v1819_v59, 2 }
  0x30   : > { %700 = vrot.lane.b32.xlu0 %v663_v17, %s1583_s11  ;;  %v495_v2 = vrot.slane %v426_v56, 7  ;;  %v695_v7 = vsel %vm655_vm2, %v692_v57, %v694_v61  ;;  %v672_v9 = vrot.slane %v1816_v58, 2  ;;  %v382_v13 = vmul.f32 %v1660_v0, %v357_v3  ;;  %v361_v57 = vld [vmem:[%s1669_s13 + $0x50] sm:$0xff] }
  0x31   : > { %607 = vrot.lane.b32.xlu1 %v569_v18, %s1582_s9  ;;  %v1834_v8 = vsel %vm469_vm0, 0.0, %v494_v62  ;;  %v584_v11 = vsel %vm566_vm1, %v582_v48, %v583_v63  ;;  %v383_v14 = vmul.f32 %v1660_v0, %v358_v4  ;;  %v543_v23 = vsel %vm469_vm0, %v480_v52, 0.0 }
  0x32   : > { %696 = vrot.lane.b32.xlu2 %v658_v22, %s1583_s11  ;;  %v1839_v12 = vsel %vm469_vm0, %v494_v62, %v495_v2  ;;  %v673_v15 = vsel %vm655_vm2, %v671_v5, %v672_v9  ;;  %v783_v16 = vrot.slane %v1834_v8, 1  ;;  %v794_v18 = vrot.slane %v1834_v8, 2  ;;  %v362_v22 = vld [vmem:[%s1669_s13 + $0x58] sm:$0xff] }
  0x33   : > { %v784_v17 = vrot.slane %v1839_v12, 1  ;;  %v795_v19 = vrot.slane %v1839_v12, 2  ;;  %v401_v20 = vadd.f32 %v1674_v1, %v382_v13  ;;  %v402_v21 = vadd.f32 %v1674_v1, %v383_v14 }
  0x34   : > { %v386_v24 = vmul.f32 %v1660_v0, %v361_v57  ;;  %v585_v25 = vrot.slane %v543_v23, 1  ;;  %v387_v27 = vmul.f32 %v1660_v0, %v362_v22  ;;  %v674_v39 = vrot.slane %v543_v23, 2 }
  0x35   : > { %v785_v26 = vsel %vm566_vm1, %v783_v16, %v784_v17  ;;  %v796_v28 = vsel %vm655_vm2, %v794_v18, %v795_v19  ;;  %v417_v29 = vmax.f32 %v401_v20, 0.0  ;;  %v418_v30 = vmax.f32 %v402_v21, 0.0 }
  0x36   : > { %v405_v33 = vadd.f32 %v1674_v1, %v386_v24  ;;  %v406_v32 = vadd.f32 %v1674_v1, %v387_v27  ;;  %v675_v50 = vsel %vm655_vm2, %v672_v9, %v674_v39 }
  0x37   : > { %v482_v41 = vrot.slane %v417_v29, 7 }
  0x38   : > { %706 = vrot.lane.b32.xlu0 %v670_v31, %s1583_s11  ;;  %v548_v31 = vsel %vm469_vm0, %v495_v2, 0.0  ;;  %v421_v46 = vmax.f32 %v405_v33, 0.0  ;;  %v422_v51 = vmax.f32 %v406_v32, 0.0  ;;  %v370_v33 = vld [vmem:[%s1704_s30 + $0x18] sm:$0xff] }
  0x39   : > { %609 = vrot.lane.b32.xlu1 %v571_v35, %s1582_s9  ;;  %v586_v35 = vsel %vm566_vm1, %v583_v63, %v585_v25  ;;  %v786_v40 = vrot.slane %v548_v31, 1  ;;  %v797_v49 = vrot.slane %v548_v31, 2  ;;  %v1873_v53 = vsel %vm469_vm0, 0.0, %v482_v41  ;;  %v360_v63 = vld [vmem:[%s1669_s13 + $0x48] sm:$0xff]  ;;  %v369_v31 = vld [vmem:[%s1704_s30 + $0x10] sm:$0xff] }
  0x3a   : > { %613 = vrot.lane.b32.xlu2 %v576_v43, %s1582_s9  ;;  %v483_v43 = vrot.slane %v418_v30, 7  ;;  %v587_v56 = vrot.slane %v1873_v53, 1  ;;  %v489_v61 = vrot.slane %v422_v51, 7  ;;  %v676_v62 = vrot.slane %v1873_v53, 2 }
  0x3b   : > { %v787_v34 = vsel %vm566_vm1, %v784_v17, %v786_v40  ;;  %v798_v44 = vsel %vm655_vm2, %v795_v19, %v797_v49  ;;  %v385_v9 = vmul.f32 %v1660_v0, %v360_v63  ;;  %v438_v39 = vmul.f32 %v1660_v0, %v369_v31 }
  0x3c   : > { %v1870_v52 = vsel %vm469_vm0, %v482_v41, %v483_v43  ;;  %v544_v14 = vsel %vm469_vm0, %v483_v43, 0.0  ;;  %v546_v25 = vsel %vm469_vm0, %v489_v61, 0.0  ;;  %v439_v32 = vmul.f32 %v1660_v0, %v370_v33 }
  0x3d   : > { %v677_v48 = vrot.slane %v1870_v52, 2  ;;  %v404_v18 = vadd.f32 %v1674_v1, %v385_v9  ;;  %v590_v19 = vrot.slane %v544_v14, 1  ;;  %v679_v21 = vrot.slane %v544_v14, 2  ;;  %v1434_v9 = vld [vmem:[%s2283_s2 + $0x20] sm:$0xff] }
  0x3e   : > { %v689_v30 = vrot.slane %v546_v25, 2  ;;  %v441_v49 = vadd.f32 %v1674_v1, %v439_v32 }
  0x3f   : > { %v420_v23 = vmax.f32 %v404_v18, 0.0  ;;  %v680_v27 = vsel %vm655_vm2, %v677_v48, %v679_v21  ;;  %v1433_v21 = vld [vmem:[%s2283_s2 + $0x18] sm:$0xff] }
  0x40   : > { %637 = vrot.lane.b32.xlu0 %v606_v54, %s1582_s9  ;;  %v488_v54 = vrot.slane %v421_v46, 7  ;;  %v440_v46 = vadd.f32 %v1674_v1, %v438_v39 }
  0x41   : > { %698 = vrot.lane.b32.xlu1 %v660_v55, %s1583_s11  ;;  %v359_v55 = vld [vmem:[%s1669_s13 + $0x40] sm:$0xff]  ;;  %v486_v29 = vrot.slane %v420_v23, 7 }
  0x42   : > { %702 = vrot.lane.b32.xlu2 %v665_v60, %s1583_s11  ;;  %v588_v60 = vrot.slane %v1870_v52, 1  ;;  %v1885_v2 = vsel %vm469_vm0, 0.0, %v488_v54  ;;  %v384_v3 = vmul.f32 %v1660_v0, %v359_v55  ;;  %v442_v0 = vmax.f32 %v440_v46, 0.0 }
  0x43   : > { %v597_v4 = vrot.slane %v1885_v2, 1  ;;  %v686_v16 = vrot.slane %v1885_v2, 2  ;;  %v446_v55 = vstv %s445_s12 }
  0x44   : > { %v589_v5 = vsel %vm566_vm1, %v587_v56, %v588_v60  ;;  %v591_v24 = vsel %vm566_vm1, %v588_v60, %v590_v19 }
  0x48   : > { %726 = vrot.lane.b32.xlu0 %v695_v7, %s1583_s11  ;;  %v1892_v7 = vsel %vm469_vm0, %v488_v54, %v489_v61  ;;  %v443_v54 = vmax.f32 %v441_v49, 0.0 }
  0x49   : > { %619 = vrot.lane.b32.xlu1 %v584_v11, %s1582_s9  ;;  %v678_v11 = vsel %vm655_vm2, %v676_v62, %v677_v48  ;;  %v598_v13 = vrot.slane %v1892_v7, 1  ;;  %v687_v17 = vrot.slane %v1892_v7, 2 }
  0x4a   : > { %708 = vrot.lane.b32.xlu2 %v673_v15, %s1583_s11  ;;  %v403_v15 = vadd.f32 %v1674_v1, %v384_v3  ;;  %v447_v1 = vmul.f32 %v446_v55, %v442_v0  ;;  %v448_v61 = vmul.f32 %v446_v55, %v443_v54  ;;  %v1435_v3 = vld [vmem:[%s2283_s2 + $0x28] sm:$0xff] }
  0x4b   : > { %v599_v57 = vsel %vm566_vm1, %v597_v4, %v598_v13  ;;  %v688_v22 = vsel %vm655_vm2, %v686_v16, %v687_v17  ;;  %v1944_v4 = vld [vmem:[%s2283_s2 + $0x40] sm:$0xff]  ;;  %1489 = vmatpush.msra.mxu3 %v1435_v3  ;;  %875 = vmatpush.msra.mxu0 %v1435_v3 }
  0x4c   : > { %v419_v20 = vmax.f32 %v403_v15, 0.0  ;;  %v497_v48 = vrot.slane %v447_v1, 7  ;;  %v498_v63 = vrot.slane %v448_v61, 7  ;;  %1049 = vmatpush.msra.mxu2 %v1944_v4 }
  0x4d   : > { %1490 = vmatpush.msra.mxu3 %v1434_v9  ;;  %876 = vmatpush.msra.mxu0 %v1434_v9 }
  0x4e   : > { %v1956_v15 = vsel %vm469_vm0, %v497_v48, %v498_v63 }
  0x4f   : > { %v1001_v18 = vrot.slane %v1956_v15, 1  ;;  %1491 = vmatpush.msra.mxu3 %v1433_v21  ;;  %877 = vmatpush.msra.mxu0 %v1433_v21 }
  0x50   : > { %788 = vrot.lane.b32.xlu0 %v785_v26, %s1582_s9  ;;  %v485_v26 = vrot.slane %v419_v20, 7  ;;  %v1012_v20 = vrot.slane %v1956_v15, 2 }
  0x51   : > { %799 = vrot.lane.b32.xlu1 %v796_v28, %s1583_s11  ;;  %v600_v28 = vrot.slane %v546_v25, 1  ;;  %v779_v25 = vld [vmem:[%s2283_s2 + $0x8] sm:$0xff] }
  0x52   : > { %621 = vrot.lane.b32.xlu2 %v586_v35, %s1582_s9  ;;  %v1915_v35 = vsel %vm469_vm0, 0.0, %v485_v26  ;;  %v1925_v43 = vsel %vm469_vm0, %v485_v26, %v486_v29 }
  0x53   : > { %v592_v40 = vrot.slane %v1915_v35, 1  ;;  %v601_v41 = vsel %vm566_vm1, %v598_v13, %v600_v28  ;;  %v593_v51 = vrot.slane %v1925_v43, 1  ;;  %v681_v56 = vrot.slane %v1915_v35, 2  ;;  %v1469_v13 = vld [vmem:[%s2283_s2 + $0x38] sm:$0xff] }
  0x54   : > { %v682_v60 = vrot.slane %v1925_v43, 2  ;;  %1050 = vmatpush.msra.mxu2 %v1469_v13  ;;  %v549_v28 = vsel %vm469_vm0, %v498_v63, 0.0 }
  0x58   : > { %710 = vrot.lane.b32.xlu0 %v675_v50, %s1583_s11  ;;  %v690_v50 = vsel %vm655_vm2, %v687_v17, %v689_v30  ;;  %v778_v30 = vld [vmem:[%s2283_s2] sm:$0xff] }
  0x59   : > { %790 = vrot.lane.b32.xlu1 %v787_v34, %s1582_s9  ;;  %v545_v34 = vsel %vm469_vm0, %v486_v29, 0.0  ;;  %v1014_v29 = vrot.slane %v549_v28, 2 }
  0x5a   : > { %801 = vrot.lane.b32.xlu2 %v798_v44, %s1583_s11  ;;  %v594_v44 = vsel %vm566_vm1, %v592_v40, %v593_v51  ;;  %v595_v62 = vrot.slane %v545_v34, 1 }
  0x5b   : > { %v1015_v31 = vsel %vm655_vm2, %v1012_v20, %v1014_v29 }
  0x5c   : > { %v596_v14 = vsel %vm566_vm1, %v593_v51, %v595_v62 }
  0x60   : > { %623 = vrot.lane.b32.xlu0 %v589_v5, %s1582_s9  ;;  %v684_v5 = vrot.slane %v545_v34, 2 }
  0x61   : > { %712 = vrot.lane.b32.xlu1 %v678_v11, %s1583_s11  ;;  %v683_v11 = vsel %vm655_vm2, %v681_v56, %v682_v60 }
  0x62   : > { %631 = vrot.lane.b32.xlu2 %v599_v57, %s1582_s9  ;;  %v1959_v57 = vsel %vm469_vm0, 0.0, %v497_v48  ;;  %v685_v16 = vsel %vm655_vm2, %v682_v60, %v684_v5 }
  0x63   : > { %v1000_v17 = vrot.slane %v1959_v57, 1  ;;  %v1011_v19 = vrot.slane %v1959_v57, 2 }
  0x65   : > { %v1002_v23 = vsel %vm566_vm1, %v1000_v17, %v1001_v18 }
  0x68   : > { %720 = vrot.lane.b32.xlu0 %v688_v22, %s1583_s11  ;;  %v1468_v22 = vld [vmem:[%s2283_s2 + $0x30] sm:$0xff] }
  0x69   : > { %625 = vrot.lane.b32.xlu1 %v591_v24, %s1582_s9  ;;  %1051 = vmatpush.msra.mxu2 %v1468_v22  ;;  %v780_v24 = vld [vmem:[%s2283_s2 + $0x10] sm:$0xff] }
  0x6a   : > { %714 = vrot.lane.b32.xlu2 %v680_v27, %s1583_s11  ;;  %v1013_v27 = vsel %vm655_vm2, %v1011_v19, %v1012_v20  ;;  %946 = vmatpush.msra.mxu1 %v780_v24 }
  0x6b   : > { %1492 = vmatpush.msrb.mxu3 %v780_v24 }
  0x6c   : > { %947 = vmatpush.msra.mxu1 %v779_v25 }
  0x6d   : > { %1493 = vmatpush.msrb.mxu3 %v779_v25 }
  0x6e   : > { %948 = vmatpush.msra.mxu1 %v778_v30 }
  0x6f   : > { %1494 = vmatpush.msrb.mxu3 %v778_v30 }
  0x70   : > { %633 = vrot.lane.b32.xlu0 %v601_v41, %s1582_s9  ;;  %v1003_v41 = vrot.slane %v549_v28, 1 }
  0x71   : > { %722 = vrot.lane.b32.xlu1 %v690_v50, %s1583_s11 }
  0x72   : > { %627 = vrot.lane.b32.xlu2 %v594_v44, %s1582_s9  ;;  %v1004_v46 = vsel %vm566_vm1, %v1001_v18, %v1003_v41 }
  0x78   : > { %716 = vrot.lane.b32.xlu0 %v683_v11, %s1583_s11 }
  0x79   : > { %629 = vrot.lane.b32.xlu1 %v596_v14, %s1582_s9 }
  0x7a   : > { %718 = vrot.lane.b32.xlu2 %v685_v16, %s1583_s11 }
  0x7c   : > { %v636_v26 = vpop.permute.xlu2 %635 }
  0x7d   : > { %v759_v49 = vsel %vm744_vm3, %v1741_v47, %v636_v26 }
  0x80   : > { %1005 = vrot.lane.b32.xlu0 %v1002_v23, %s1582_s9 }
  0x81   : > { %1016 = vrot.lane.b32.xlu1 %v1013_v27, %s1583_s11 }
  0x82   : > { %1007 = vrot.lane.b32.xlu2 %v1004_v46, %s1582_s9 }
  0x84   : > { %v618_v33 = vpop.permute.xlu2 %617 }
  0x85   : > { %v750_v48 = vsel %vm744_vm3, %v1716_v36, %v618_v33 }
  0x88   : > { %1018 = vrot.lane.b32.xlu0 %v1015_v31, %s1583_s11 }
  0x8c   : > { %v697_v32 = vpop.permute.xlu2 %696 }
  0x92   : > { %v616_v39 = vpop.permute.xlu0 %615 }
  0x93   : > { %v612_v40 = vpop.permute.xlu1 %611  ;;  %v749_v50 = vsel %vm744_vm3, %v1719_v37, %v616_v39 }
  0x94   : > { %v614_v44 = vpop.permute.xlu2 %613  ;;  %v747_v47 = vsel %vm744_vm3, %v1722_v38, %v612_v40 }
  0x95   : > { %v748_v61 = vsel %vm744_vm3, %v1731_v42, %v614_v44 }
  0x9a   : > { %v705_v51 = vpop.permute.xlu0 %704 }
  0x9b   : > { %v725_v34 = vpop.permute.xlu1 %724  ;;  %v766_v0 = vsel %vm761_vm4, %v749_v50, %v705_v51 }
  0x9c   : > { %v1999_v54 = vsel %vm761_vm4, %v759_v49, %v725_v34  ;;  %1471 = vmatmul.msk.f32.vlgmr.msra.gmra.mxu2 %vm813_vm5, %v766_v0  ;;  %v703_v62 = vpop.permute.xlu2 %702 }
  0x9d   : > { %1448 = vmatmul.msk.f32.vlgmr.msra.gmra.mxu3 %vm813_vm5, %v1999_v54  ;;  %v765_v38 = vsel %vm761_vm4, %v748_v61, %v703_v62 }
  0x9e   : > { %1495 = vmatpush.msra.mxu3 %v1944_v4 }
  0xa0   : > { %1496 = vmatpush.msra.mxu3 %v1469_v13 }
  0xa2   : > { %v701_v37 = vpop.permute.xlu0 %700  ;;  %1497 = vmatpush.msra.mxu3 %v1468_v22 }
  0xa3   : > { %v608_v55 = vpop.permute.xlu1 %607  ;;  %v764_v56 = vsel %vm761_vm4, %v747_v47, %v701_v37 }
  0xa4   : > { %v745_v60 = vsel %vm744_vm3, %v1765_v6, %v608_v55  ;;  %1436 = vmatmul.msk.f32.vlgmr.msra.gmra.mxu0 %vm813_vm5, %v764_v56  ;;  %v709_v5 = vpop.permute.xlu2 %708 }
  0xa5   : > { %v762_v1 = vsel %vm761_vm4, %v745_v60, %v697_v32 }
  0xa6   : > { %1452 = vmatmul.msk.f32.vlgmr.msra.gmra.mxu1 %vm813_vm5, %v762_v1 }
  0xaa   : > { %v707_v63 = vpop.permute.xlu0 %706 }
  0xab   : > { %v610_v3 = vpop.permute.xlu1 %609  ;;  %v767_v4 = vsel %vm761_vm4, %v750_v48, %v707_v63 }
  0xac   : > { %1437 = vmatmul.msk.f32.gmra.mxu0 %vm813_vm5, %v765_v38  ;;  %1472 = vmatmul.msk.f32.gmra.mxu2 %vm813_vm5, %v767_v4  ;;  %v746_v42 = vsel %vm744_vm3, %v1773_v10, %v610_v3  ;;  %v622_v10 = vpop.permute.xlu2 %621 }
  0xad   : > { %v752_v22 = vsel %vm744_vm3, %v1816_v58, %v622_v10 }
  0xb2   : > { %v638_v6 = vpop.permute.xlu0 %637 }
  0xb3   : > { %v699_v9 = vpop.permute.xlu1 %698  ;;  %v760_v36 = vsel %vm744_vm3, %v1737_v45, %v638_v6 }
  0xb4   : > { %1438 = vmatmul.msk.f32.gmra.mxu0 %vm813_vm5, %v766_v0  ;;  %v763_v11 = vsel %vm761_vm4, %v746_v42, %v699_v9  ;;  %v802_v21 = vpop.permute.xlu2 %801 }
  0xb5   : > { %1453 = vmatmul.msk.f32.gmra.mxu1 %vm813_vm5, %v763_v11 }
  0xba   : > { %v727_v13 = vpop.permute.xlu0 %726 }
  0xbb   : > { %v620_v14 = vpop.permute.xlu1 %619  ;;  %v2029_v16 = vsel %vm761_vm4, %v760_v36, %v727_v13 }
  0xbc   : > { %v751_v17 = vsel %vm744_vm3, %v1819_v59, %v620_v14  ;;  %1439 = vmatmul.msk.f32.gmra.mxu0 %vm813_vm5, %v767_v4  ;;  %1449 = vmatmul.msk.f32.gmra.mxu3 %vm813_vm5, %v2029_v16  ;;  %v632_v27 = vpop.permute.xlu2 %631 }
  0xbd   : > { %1454 = vmatmul.msk.f32.gmra.mxu1 %vm813_vm5, %v764_v56  ;;  %v768_v18 = vsel %vm761_vm4, %v751_v17, %v709_v5 }
  0xbe   : > { %1473 = vmatmul.msk.f32.gmra.mxu2 %vm813_vm5, %v768_v18 }
  0xc2   : > { %v789_v45 = vpop.permute.xlu0 %788 }
  0xc3   : > { %v805_v19 = vsel %vm744_vm3, %v1834_v8, %v789_v45  ;;  %v800_v20 = vpop.permute.xlu1 %799 }
  0xc4   : > { %1440 = vmatmul.msk.f32.gmra.mxu0 %vm813_vm5, %v768_v18  ;;  %v807_v59 = vsel %vm761_vm4, %v805_v19, %v800_v20  ;;  %v715_v33 = vpop.permute.xlu2 %714 }
  0xc5   : > { %1455 = vmatmul.msk.f32.gmra.mxu1 %vm813_vm5, %v765_v38  ;;  %1450 = vmatmul.msk.f32.gmra.mxu3 %vm813_vm5, %v807_v59 }
  0xca   : > { %v711_v23 = vpop.permute.xlu0 %710 }
  0xcb   : > { %v791_v24 = vpop.permute.xlu1 %790  ;;  %v769_v25 = vsel %vm761_vm4, %v752_v22, %v711_v23 }
  0xcc   : > { %v806_v8 = vsel %vm744_vm3, %v1839_v12, %v791_v24  ;;  %1441 = vmatmul.msk.f32.gmra.mxu0 %vm813_vm5, %v769_v25  ;;  %1474 = vmatmul.msk.f32.gmra.mxu2 %vm813_vm5, %v769_v25  ;;  %v757_v12 = vsel %vm744_vm3, %v1885_v2, %v632_v27  ;;  %v628_v50 = vpop.permute.xlu2 %627 }
  0xcd   : > { %1456 = vmatmul.msk.f32.gmra.mxu1 %vm813_vm5, %v766_v0  ;;  %v808_v26 = vsel %vm761_vm4, %v806_v8, %v802_v21 }
  0xce   : > { %1451 = vmatmul.msk.f32.gmra.mxu3 %vm813_vm5, %v808_v26 }
  0xd2   : > { %v624_v28 = vpop.permute.xlu0 %623 }
  0xd3   : > { %v753_v58 = vsel %vm744_vm3, %v1873_v53, %v624_v28  ;;  %v713_v29 = vpop.permute.xlu1 %712 }
  0xd4   : > { %v770_v30 = vsel %vm761_vm4, %v753_v58, %v713_v29  ;;  %v719_v44 = vpop.permute.xlu2 %718 }
  0xd5   : > { %1457 = vmatmul.msk.f32.gmra.mxu1 %vm813_vm5, %v767_v4  ;;  %1442 = vmatmul.msk.f32.gmra.mxu0 %vm813_vm5, %v770_v30 }
  0xd6   : > { %1475 = vmatmul.msk.f32.gmra.mxu2 %vm813_vm5, %v770_v30 }
  0xda   : > { %v721_v31 = vpop.permute.xlu0 %720 }
  0xdb   : > { %v774_v39 = vsel %vm761_vm4, %v757_v12, %v721_v31  ;;  %v626_v32 = vpop.permute.xlu1 %625 }
  0xdc   : > { %v754_v53 = vsel %vm744_vm3, %v1870_v52, %v626_v32  ;;  %1464 = vmatmul.msk.f32.vlgmr.msrb.gmra.mxu3 %vm813_vm5, %v774_v39  ;;  %v755_v52 = vsel %vm744_vm3, %v1915_v35, %v628_v50  ;;  %v1008_v56 = vpop.permute.xlu2 %1007 }
  0xdd   : > { %1458 = vmatmul.msk.f32.gmra.mxu1 %vm813_vm5, %v768_v18  ;;  %v771_v40 = vsel %vm761_vm4, %v754_v53, %v715_v33  ;;  %v1023_v60 = vsel %vm744_vm3, %v1956_v15, %v1008_v56 }
  0xde   : > { %1476 = vmatmul.msk.f32.gmra.mxu2 %vm813_vm5, %v771_v40  ;;  %1443 = vmatmul.msk.f32.gmra.mxu0 %vm813_vm5, %v771_v40 }
  0xe2   : > { %v634_v41 = vpop.permute.xlu0 %633 }
  0xe3   : > { %v758_v2 = vsel %vm744_vm3, %v1892_v7, %v634_v41  ;;  %v723_v46 = vpop.permute.xlu1 %722 }
  0xe4   : > { %v775_v49 = vsel %vm761_vm4, %v758_v2, %v723_v46 }
  0xe5   : > { %1459 = vmatmul.msk.f32.gmra.mxu1 %vm813_vm5, %v769_v25  ;;  %1465 = vmatmul.msk.f32.gmra.mxu3 %vm813_vm5, %v775_v49 }
  0xea   : > { %v717_v51 = vpop.permute.xlu0 %716 }
  0xeb   : > { %v772_v34 = vsel %vm761_vm4, %v755_v52, %v717_v51  ;;  %v630_v0 = vpop.permute.xlu1 %629 }
  0xec   : > { %1444 = vmatmul.msk.f32.gmra.mxu0 %vm813_vm5, %v772_v34  ;;  %1477 = vmatmul.msk.f32.gmra.mxu2 %vm813_vm5, %v772_v34  ;;  %v756_v7 = vsel %vm744_vm3, %v1925_v43, %v630_v0 }
  0xed   : > { %1460 = vmatmul.msk.f32.gmra.mxu1 %vm813_vm5, %v770_v30  ;;  %1466 = vmatmul.msk.f32.gmra.mxu3 %vm813_vm5, %v1999_v54  ;;  %v773_v47 = vsel %vm761_vm4, %v756_v7, %v719_v44 }
  0xf2   : > { %v1006_v35 = vpop.permute.xlu0 %1005 }
  0xf3   : > { %v1022_v43 = vsel %vm744_vm3, %v1959_v57, %v1006_v35  ;;  %v1017_v37 = vpop.permute.xlu1 %1016 }
  0xf4   : > { %1445 = vmatmul.msk.f32.gmra.mxu0 %vm813_vm5, %v773_v47  ;;  %1478 = vmatmul.msk.f32.gmra.mxu2 %vm813_vm5, %v773_v47  ;;  %v1024_v55 = vsel %vm761_vm4, %v1022_v43, %v1017_v37 }
  0xf5   : > { %1461 = vmatmul.msk.f32.gmra.mxu1 %vm813_vm5, %v771_v40  ;;  %1467 = vmatmul.msk.f32.gmra.mxu3 %vm813_vm5, %v2029_v16 }
  0xfa   : > { %v1019_v1 = vpop.permute.xlu0 %1018 }
  0xfb   : > { %v1025_v61 = vsel %vm761_vm4, %v1023_v60, %v1019_v1 }
  0xfc   : > { %1446 = vmatmul.msk.f32.gmra.mxu0 %vm813_vm5, %v774_v39  ;;  %1479 = vmatmul.msk.f32.gmra.mxu2 %vm813_vm5, %v774_v39 }
  0xfd   : > { %1462 = vmatmul.msk.f32.gmra.mxu1 %vm813_vm5, %v772_v34  ;;  %1483 = vmatmul.msk.f32.vlgmr.msra.gmra.mxu3 %vm813_vm5, %v807_v59 }
 0x104   : > { %1447 = vmatmul.msk.f32.gmra.mxu0 %vm813_vm5, %v775_v49  ;;  %1480 = vmatmul.msk.f32.gmra.mxu2 %vm813_vm5, %v775_v49 }
 0x105   : > { %1463 = vmatmul.msk.f32.gmra.mxu1 %vm813_vm5, %v773_v47  ;;  %1484 = vmatmul.msk.f32.gmra.mxu3 %vm813_vm5, %v808_v26 }
 0x10c   : > { %1481 = vmatmul.msk.f32.gmra.mxu2 %vm813_vm5, %v1999_v54 }
 0x10d   : > { %1485 = vmatmul.msk.f32.gmra.mxu3 %vm813_vm5, %v1024_v55 }
 0x114   : > { %1482 = vmatmul.msk.f32.gmra.mxu2 %vm813_vm5, %v2029_v16 }
 0x115   : > { %1486 = vmatmul.msk.f32.gmra.mxu3 %vm813_vm5, %v1025_v61 }
 0x11f   : > { %v1053_v48 = vpop.f32.mrf.mxu2 }
 0x120   : > { %v915_v9 = vpop.f32.mrf.mxu3 }
 0x121   : > { %v879_v57 = vpop.f32.mrf.mxu0 }
 0x123   : > { %v950_v62 = vpop.f32.mrf.mxu1 }
 0x124   : > { %v951_v38 = vadd.f32 %v950_v62, %v879_v57 }
 0x126   : > { %v2119_v15 = vadd.f32 %v1053_v48, %v951_v38 }
 0x128   : > { %1117 = vst.msk [vmem:[%s2117_s18] sm:$0xff] %vm744_vm3, %v2119_v15  ;;  %v1133_v48 = vsel %vm744_vm3, %v2119_v15, 0.0 }
 0x129   : > { %v882_v54 = vpop.f32.mrf.mxu0 }
 0x12f   : > { %v1056_v4 = vpop.f32.mrf.mxu2 }
 0x131   : > { %v885_v42 = vpop.f32.mrf.mxu0 }
 0x132   : > { %v953_v63 = vpop.f32.mrf.mxu1 }
 0x133   : > { %v954_v3 = vadd.f32 %v953_v63, %v882_v54 }
 0x135   : > { %v2124_v6 = vadd.f32 %v1056_v4, %v954_v3 }
 0x137   : > { %1118 = vst.msk [vmem:[%s2117_s18 + $0x8] sm:$0xff] %vm744_vm3, %v2124_v6 }
 0x139   : > { %v888_v17 = vpop.f32.mrf.mxu0 }
 0x13a   : > { %v956_v5 = vpop.f32.mrf.mxu1 }
 0x13b   : > { %v957_v11 = vadd.f32 %v956_v5, %v885_v42 }
 0x13f   : > { %v918_v16 = vpop.f32.mrf.mxu3 }
 0x141   : > { %v1059_v36 = vpop.f32.mrf.mxu2  ;;  %v891_v20 = vpop.f32.mrf.mxu0 }
 0x142   : > { %v2129_v13 = vadd.f32 %v1059_v36, %v957_v11  ;;  %v959_v14 = vpop.f32.mrf.mxu1 }
 0x143   : > { %v960_v18 = vadd.f32 %v959_v14, %v888_v17 }
 0x144   : > { %1119 = vst.msk [vmem:[%s2117_s18 + $0x10] sm:$0xff] %vm744_vm3, %v2129_v13  ;;  %v1134_v38 = vsel %vm744_vm3, %v2129_v13, 0.0 }
 0x145   : > { %v1135_v63 = vadd.f32 %v1134_v38, %v1133_v48 }
 0x148   : > { %v921_v45 = vpop.f32.mrf.mxu3 }
 0x149   : > { %v894_v25 = vpop.f32.mrf.mxu0 }
 0x14a   : > { %v962_v10 = vpop.f32.mrf.mxu1 }
 0x14b   : > { %v963_v23 = vadd.f32 %v962_v10, %v891_v20 }
 0x14f   : > { %v1062_v19 = vpop.f32.mrf.mxu2 }
 0x150   : > { %v2134_v59 = vadd.f32 %v1062_v19, %v960_v18  ;;  %v1148_v18 = vsel %vm744_vm3, %v2124_v6, 0.0 }
 0x151   : > { %v2139_v22 = vpop.f32.mrf.mxu3 }
 0x152   : > { %1120 = vst.msk [vmem:[%s2117_s18 + $0x18] sm:$0xff] %vm744_vm3, %v2134_v59  ;;  %v965_v21 = vpop.f32.mrf.mxu1  ;;  %v897_v30 = vpop.f32.mrf.mxu0  ;;  %v1149_v11 = vsel %vm744_vm3, %v2134_v59, 0.0 }
 0x153   : > { %v966_v27 = vadd.f32 %v965_v21, %v894_v25  ;;  %v1150_v20 = vadd.f32 %v1149_v11, %v1148_v18 }
 0x159   : > { %v1065_v24 = vpop.f32.mrf.mxu2 }
 0x15a   : > { %v2141_v8 = vadd.f32 %v1065_v24, %v963_v23  ;;  %v968_v28 = vpop.f32.mrf.mxu1 }
 0x15b   : > { %v900_v33 = vpop.f32.mrf.mxu0  ;;  %v969_v39 = vadd.f32 %v968_v28, %v897_v30 }
 0x15c   : > { %1121 = vst.msk [vmem:[%s2117_s18 + $0x20] sm:$0xff] %vm744_vm3, %v2141_v8  ;;  %v1136_v54 = vsel %vm744_vm3, %v2141_v8, 0.0 }
 0x15d   : > { %v1137_v5 = vadd.f32 %v1136_v54, %v1135_v63 }
 0x15f   : > { %v986_v26 = vpop.f32.mrf.mxu3 }
 0x160   : > { %v987_v0 = vadd.f32 %v986_v26, %v915_v9 }
 0x161   : > { %v1068_v58 = vpop.f32.mrf.mxu2 }
 0x162   : > { %v2146_v29 = vadd.f32 %v1068_v58, %v966_v27  ;;  %v971_v31 = vpop.f32.mrf.mxu1 }
 0x163   : > { %v972_v46 = vadd.f32 %v971_v31, %v900_v33 }
 0x164   : > { %1122 = vst.msk [vmem:[%s2117_s18 + $0x28] sm:$0xff] %vm744_vm3, %v2146_v29  ;;  %v1151_v19 = vsel %vm744_vm3, %v2146_v29, 0.0 }
 0x165   : > { %v1152_v26 = vadd.f32 %v1151_v19, %v1150_v20 }
 0x168   : > { %v989_v12 = vpop.f32.mrf.mxu3 }
 0x169   : > { %v903_v41 = vpop.f32.mrf.mxu0  ;;  %v990_v55 = vadd.f32 %v989_v12, %v918_v16 }
 0x16a   : > { %v974_v2 = vpop.f32.mrf.mxu1 }
 0x16b   : > { %v975_v51 = vadd.f32 %v974_v2, %v903_v41 }
 0x16f   : > { %v1071_v32 = vpop.f32.mrf.mxu2 }
 0x170   : > { %v2151_v53 = vadd.f32 %v1071_v32, %v969_v39  ;;  %v992_v40 = vpop.f32.mrf.mxu3 }
 0x171   : > { %v906_v34 = vpop.f32.mrf.mxu0  ;;  %v993_v42 = vadd.f32 %v992_v40, %v921_v45 }
 0x172   : > { %1123 = vst.msk [vmem:[%s2117_s18 + $0x30] sm:$0xff] %vm744_vm3, %v2151_v53  ;;  %v977_v7 = vpop.f32.mrf.mxu1  ;;  %v1138_v3 = vsel %vm744_vm3, %v2151_v53, 0.0 }
 0x173   : > { %v978_v37 = vadd.f32 %v977_v7, %v906_v34  ;;  %v1139_v17 = vadd.f32 %v1138_v3, %v1137_v5 }
 0x177   : > { %v1074_v49 = vpop.f32.mrf.mxu2 }
 0x178   : > { %v2156_v50 = vadd.f32 %v1074_v49, %v972_v46  ;;  %v995_v52 = vpop.f32.mrf.mxu3 }
 0x179   : > { %v909_v61 = vpop.f32.mrf.mxu0  ;;  %v996_v12 = vadd.f32 %v995_v52, %v2139_v22 }
 0x17a   : > { %1124 = vst.msk [vmem:[%s2117_s18 + $0x38] sm:$0xff] %vm744_vm3, %v2156_v50  ;;  %v980_v57 = vpop.f32.mrf.mxu1  ;;  %v1153_v25 = vsel %vm744_vm3, %v2156_v50, 0.0 }
 0x17b   : > { %v981_v4 = vadd.f32 %v980_v57, %v909_v61  ;;  %v1154_v30 = vadd.f32 %v1153_v25, %v1152_v26 }
 0x17f   : > { %v1077_v44 = vpop.f32.mrf.mxu2 }
 0x180   : > { %v2161_v47 = vadd.f32 %v1077_v44, %v975_v51  ;;  %v1089_v35 = vpop.f32.mrf.mxu3 }
 0x181   : > { %v2163_v43 = vadd.f32 %v1089_v35, %v987_v0  ;;  %v912_v23 = vpop.f32.mrf.mxu0 }
 0x182   : > { %1125 = vst.msk [vmem:[%s2117_s18 + $0x40] sm:$0xff] %vm744_vm3, %v2161_v47  ;;  %v1140_v36 = vsel %vm744_vm3, %v2161_v47, 0.0  ;;  %v983_v24 = vpop.f32.mrf.mxu1 }
 0x183   : > { %1129 = vst.msk [vmem:[%s2117_s18 + $0x60] sm:$0xff] %vm744_vm3, %v2163_v43  ;;  %v1141_v21 = vadd.f32 %v1140_v36, %v1139_v17  ;;  %v984_v28 = vadd.f32 %v983_v24, %v912_v23  ;;  %v1144_v33 = vsel %vm744_vm3, %v2163_v43, 0.0 }
 0x187   : > { %v1080_v56 = vpop.f32.mrf.mxu2 }
 0x188   : > { %v2171_v60 = vadd.f32 %v1080_v56, %v978_v37  ;;  %v1092_v1 = vpop.f32.mrf.mxu3 }
 0x189   : > { %v2173_v62 = vadd.f32 %v1092_v1, %v990_v55 }
 0x18a   : > { %1126 = vst.msk [vmem:[%s2117_s18 + $0x48] sm:$0xff] %vm744_vm3, %v2171_v60  ;;  %v1155_v58 = vsel %vm744_vm3, %v2171_v60, 0.0 }
 0x18b   : > { %1130 = vst.msk [vmem:[%s2117_s18 + $0x68] sm:$0xff] %vm744_vm3, %v2173_v62  ;;  %v1156_v40 = vadd.f32 %v1155_v58, %v1154_v30  ;;  %v1159_v51 = vsel %vm744_vm3, %v2173_v62, 0.0 }
 0x18f   : > { %v1083_v9 = vpop.f32.mrf.mxu2 }
 0x190   : > { %v1111_v14 = vadd.f32 %v1083_v9, %v981_v4  ;;  %v1095_v16 = vpop.f32.mrf.mxu3 }
 0x191   : > { %v2193_v10 = vadd.f32 %v1095_v16, %v993_v42 }
 0x192   : > { %1127 = vst.msk [vmem:[%s2117_s18 + $0x50] sm:$0xff] %vm744_vm3, %v1111_v14  ;;  %v1142_v45 = vsel %vm744_vm3, %v1111_v14, 0.0 }
 0x193   : > { %1131 = vst.msk [vmem:[%s2117_s18 + $0x70] sm:$0xff] %vm744_vm3, %v2193_v10  ;;  %v1143_v27 = vadd.f32 %v1142_v45, %v1141_v21  ;;  %v1146_v22 = vsel %vm744_vm3, %v2193_v10, 0.0 }
 0x195   : > { %v1145_v41 = vadd.f32 %v1144_v33, %v1143_v27 }
 0x197   : > { %v1086_v31 = vpop.f32.mrf.mxu2  ;;  %v1147_v52 = vadd.f32 %v1146_v22, %v1145_v41 }
 0x198   : > { %v1112_v39 = vadd.f32 %v1086_v31, %v984_v28  ;;  %v1098_v32 = vpop.f32.mrf.mxu3 }
 0x199   : > { %v1116_v2 = vadd.f32 %v1098_v32, %v996_v12  ;;  %v1163_v44 = vsel %vm744_vm3, %v1147_v52, 0.0 }
 0x19a   : > { %1128 = vst.msk [vmem:[%s2117_s18 + $0x58] sm:$0xff] %vm744_vm3, %v1112_v39  ;;  %v1157_v46 = vsel %vm744_vm3, %v1112_v39, 0.0 }
 0x19b   : > { %v1158_v49 = vadd.f32 %v1157_v46, %v1156_v40  ;;  %1132 = vst.msk [vmem:[%s2117_s18 + $0x78] sm:$0xff] %vm744_vm3, %v1116_v2  ;;  %v1161_v0 = vsel %vm744_vm3, %v1116_v2, 0.0 }
 0x19d   : > { %v1160_v34 = vadd.f32 %v1159_v51, %v1158_v49 }
 0x19f   : > { %v1162_v7 = vadd.f32 %v1161_v0, %v1160_v34 }
 0x1a1   : > { %v1164_v35 = vsel %vm744_vm3, %v1162_v7, 0.0 }
 0x1a2   : > { %v1165_v37 = vadd.f32 %v1164_v35, %v1163_v44 }
 0x1a4   : > { %v1166_v55 = vrot.slane %v1165_v37, 4 }
 0x1a6   : > { %v1167_v56 = vadd.f32 %v1166_v55, %v1165_v37 }
 0x1a8   : > { %v1168_v1 = vrot.slane %v1167_v56, 2 }
 0x1aa   : > { %v1169_v61 = vadd.f32 %v1168_v1, %v1167_v56 }
 0x1ac   : > { %v1170_v57 = vrot.slane %v1169_v61, 1 }
 0x1ae   : > { %v2224_v38 = vadd.f32 %v1170_v57, %v1169_v61 }
 0x1b0   : > { %v1172_v48 = vmul.f32 0.0078125, %v2224_v38 }
 0x1b2   : > { %v1173_v54 = vsub.f32 %v2119_v15, %v1172_v48  ;;  %v1175_v63 = vsub.f32 %v2129_v13, %v1172_v48  ;;  %v1174_v3 = vsub.f32 %v2124_v6, %v1172_v48  ;;  %v1176_v4 = vsub.f32 %v2134_v59, %v1172_v48 }
 0x1b3   : > { %v1177_v5 = vsub.f32 %v2141_v8, %v1172_v48  ;;  %v1178_v42 = vsub.f32 %v2146_v29, %v1172_v48  ;;  %v1179_v9 = vsub.f32 %v2151_v53, %v1172_v48  ;;  %v1180_v16 = vsub.f32 %v2156_v50, %v1172_v48 }
 0x1b4   : > { %v1189_v11 = vmul.f32 %v1173_v54, %v1173_v54  ;;  %v1191_v36 = vmul.f32 %v1175_v63, %v1175_v63  ;;  %v1181_v17 = vsub.f32 %v2161_v47, %v1172_v48  ;;  %v1190_v18 = vmul.f32 %v1174_v3, %v1174_v3 }
 0x1b5   : > { %v1192_v15 = vmul.f32 %v1176_v4, %v1176_v4  ;;  %v1193_v19 = vmul.f32 %v1177_v5, %v1177_v5  ;;  %v1182_v13 = vsub.f32 %v2171_v60, %v1172_v48  ;;  %v1183_v6 = vsub.f32 %v1111_v14, %v1172_v48 }
 0x1b6   : > { %v1194_v45 = vmul.f32 %v1178_v42, %v1178_v42  ;;  %v1195_v59 = vmul.f32 %v1179_v9, %v1179_v9  ;;  %v1205_v8 = vsel %vm744_vm3, %v1189_v11, 0.0  ;;  %v1206_v29 = vsel %vm744_vm3, %v1191_v36, 0.0 }
 0x1b7   : > { %v1184_v20 = vsub.f32 %v1112_v39, %v1172_v48  ;;  %v1185_v53 = vsub.f32 %v2163_v43, %v1172_v48  ;;  %v1196_v21 = vmul.f32 %v1180_v16, %v1180_v16  ;;  %v1207_v23 = vadd.f32 %v1206_v29, %v1205_v8 }
 0x1b8   : > { %v1197_v50 = vmul.f32 %v1181_v17, %v1181_v17  ;;  %v1208_v47 = vsel %vm744_vm3, %v1193_v19, 0.0  ;;  %v1220_v24 = vsel %vm744_vm3, %v1190_v18, 0.0  ;;  %v1221_v25 = vsel %vm744_vm3, %v1192_v15, 0.0 }
 0x1b9   : > { %v1186_v60 = vsub.f32 %v2173_v62, %v1172_v48  ;;  %v1187_v14 = vsub.f32 %v2193_v10, %v1172_v48  ;;  %v1209_v26 = vadd.f32 %v1208_v47, %v1207_v23  ;;  %v1222_v27 = vadd.f32 %v1221_v25, %v1220_v24 }
 0x1ba   : > { %v1198_v28 = vmul.f32 %v1182_v13, %v1182_v13  ;;  %v1199_v58 = vmul.f32 %v1183_v6, %v1183_v6  ;;  %v1210_v30 = vsel %vm744_vm3, %v1195_v59, 0.0  ;;  %v1223_v43 = vsel %vm744_vm3, %v1194_v45, 0.0 }
 0x1bb   : > { %v1188_v12 = vsub.f32 %v1116_v2, %v1172_v48  ;;  %v1211_v31 = vadd.f32 %v1210_v30, %v1209_v26  ;;  %v1224_v33 = vadd.f32 %v1223_v43, %v1222_v27  ;;  %v1200_v39 = vmul.f32 %v1184_v20, %v1184_v20 }
 0x1bc   : > { %v1201_v32 = vmul.f32 %v1185_v53, %v1185_v53  ;;  %v1212_v40 = vsel %vm744_vm3, %v1197_v50, 0.0  ;;  %v1225_v41 = vsel %vm744_vm3, %v1196_v21, 0.0  ;;  %v1202_v10 = vmul.f32 %v1186_v60, %v1186_v60 }
 0x1bd   : > { %v1213_v62 = vadd.f32 %v1212_v40, %v1211_v31  ;;  %v1226_v46 = vadd.f32 %v1225_v41, %v1224_v33  ;;  %v1203_v49 = vmul.f32 %v1187_v14, %v1187_v14  ;;  %v1214_v51 = vsel %vm744_vm3, %v1199_v58, 0.0 }
 0x1be   : > { %v1227_v22 = vsel %vm744_vm3, %v1198_v28, 0.0  ;;  %v1204_v2 = vmul.f32 %v1188_v12, %v1188_v12  ;;  %v1216_v0 = vsel %vm744_vm3, %v1201_v32, 0.0  ;;  %v1229_v7 = vsel %vm744_vm3, %v1200_v39, 0.0 }
 0x1bf   : > { %v1215_v52 = vadd.f32 %v1214_v51, %v1213_v62  ;;  %v1228_v34 = vadd.f32 %v1227_v22, %v1226_v46  ;;  %v1218_v37 = vsel %vm744_vm3, %v1203_v49, 0.0  ;;  %v1231_v55 = vsel %vm744_vm3, %v1202_v10, 0.0 }
 0x1c0   : > { %v1233_v61 = vsel %vm744_vm3, %v1204_v2, 0.0 }
 0x1c1   : > { %v1217_v44 = vadd.f32 %v1216_v0, %v1215_v52  ;;  %v1230_v35 = vadd.f32 %v1229_v7, %v1228_v34 }
 0x1c3   : > { %v1219_v56 = vadd.f32 %v1218_v37, %v1217_v44  ;;  %v1232_v1 = vadd.f32 %v1231_v55, %v1230_v35 }
 0x1c5   : > { %v1234_v57 = vadd.f32 %v1233_v61, %v1232_v1  ;;  %v1235_v48 = vsel %vm744_vm3, %v1219_v56, 0.0 }
 0x1c7   : > { %v1236_v54 = vsel %vm744_vm3, %v1234_v57, 0.0 }
 0x1c8   : > { %v1237_v63 = vadd.f32 %v1236_v54, %v1235_v48 }
 0x1ca   : > { %v1238_v3 = vrot.slane %v1237_v63, 4 }
 0x1cc   : > { %v1239_v4 = vadd.f32 %v1238_v3, %v1237_v63 }
 0x1ce   : > { %v1240_v5 = vrot.slane %v1239_v4, 2 }
 0x1d0   : > { %v1241_v42 = vadd.f32 %v1240_v5, %v1239_v4 }
 0x1d2   : > { %v1242_v9 = vrot.slane %v1241_v42, 1 }
 0x1d4   : > { %v1243_v11 = vadd.f32 %v1242_v9, %v1241_v42 }
 0x1d6   : > { %v1244_v36 = vsel %vm469_vm0, %v2224_v38, %v1243_v11 }
 0x1d7   : > { %v1246_v16 = vsel %vm1245_vm6, %v1244_v36, 0.0 }
 0x1d8   : > { %1247 = vst.msk [vmem:[%s350_s29] sm:$0xff] %vm744_vm3, %v1246_v16 }
 0x1d9 PF: > { %s17_s25 = sadd.s32 1, %s1580_s25   ;;  %s2288_s21 = smov %s1572_s23 }
 0x1da   : > { %p14_p9 = scmp.ge.s32.totalorder %s17_s25, 6   ;;  %s2289_s22 = smov %s1576_s24 }
 0x1db   : > { %s2290_s23 = smov %s2293_s26  ;;  %s2291_s24 = smov %s2297_s27 }
 0x1dc   :  { %16 = sbr.rel (!%p14_p9) target bundleno = 3 (0x3), region = 87 }

// kernel: double_conv.2
= control target key start
LH: loop header
LB: loop body
LE: loop exit
PB: predicated region body
PF: predicated region fallthrough
CT: control target
= control target key end

     0   :  { %s1539_s21 = smov 0   ;;  %s1541_s22 = smov 0   ;;  %s2129_s0 = inlined_call_operand.vmem [shape: f32[2,16,16,8], index: 0, kind: input, shape index: {}]   ;;  %s2130_s1 = inlined_call_operand.vmem [shape: f32[2,2,2,16,8], index: 1, kind: input, shape index: {}]   ;;  %s2131_s2 = inlined_call_operand.vmem [shape: f32[3,24,8], index: 2, kind: input, shape index: {}]   ;;  %s2132_s3 = inlined_call_operand.vmem [shape: f32[1,8], index: 3, kind: input, shape index: {}]   ;;  %s2133_s4 = inlined_call_operand.vmem [shape: f32[1,8], index: 4, kind: input, shape index: {}]   ;;  %s2134_s5 = inlined_call_operand.vmem [shape: f32[2,16,16,8], index: 5, kind: output, shape index: {0}]   ;;  %s2135_s6 = inlined_call_operand.vmem [shape: f32[2,2,8,8], index: 6, kind: output, shape index: {1}]  }
   0x1   :  { %s1543_s23 = smov 0   ;;  %s1545_s24 = smov 0  }
   0x2   :  { %s1547_s25 = smov 0  }
   0x3 LB: > { %s26_s3 = sadd.s32 1, %s1492_s23  ;;  %s29_s4 = sadd.s32 1, %s1496_s24  ;;  %s1500_s25 = sphi %s1547_s25, %s17_s25   ;;  %s1496_s24 = sphi %s1545_s24, %s2139_s24   ;;  %s1492_s23 = sphi %s1543_s23, %s2138_s23   ;;  %s1488_s22 = sphi %s1541_s22, %s2137_s22   ;;  %s1484_s21 = sphi %s1539_s21, %s2136_s21  }
   0x4   : > { %p27_p0 = scmp.ge.s32.totalorder %s26_s3, 2  ;;  %p1341_p1 = scmp.ge.s32.totalorder %s1500_s25, 1 }
   0x5   : > { %p255_p2 = scmp.lt.s32.totalorder %s1500_s25, 5 }
   0x6   : > { %s2141_s3 = smov (%p27_p0, %s26_s3), 0  ;;  %s2143_s4 = smov (!%p27_p0, %s29_s4), %s1496_s24 }
   0x7   : > { %p256_p3 = pnand %p1341_p1, %p255_p2  ;;  %p31_p4 = scmp.ge.s32.totalorder %s2143_s4, 2 }
   0x8   : > { %p313_p5 = scmp.lt.s32.totalorder (!%p256_p3), %s1488_s22, 1  ;;  %p325_p6 = scmp.lt.s32.totalorder (!%p256_p3), %s1484_s21, 1 }
   0x9   : > { %s2145_s4 = smov (%p31_p4, %s2143_s4), 0  ;;  %259 = sbr.rel (%p256_p3) target bundleno = 472 (0x1d8), region = 40 }
   0xa   : > { %s1342_s26 = sshll.u32 (!%p256_p3), %s1484_s21, 3  ;;  %s1502_s19 = smov (!%p256_p3), 8  }
   0xb   : > { %p315_p7 = scmp.lt.s32.totalorder (!%p256_p3), %s1342_s26, 15  ;;  %s1503_s20 = smov (!%p256_p3), 16  }
   0xe   : > { %s2147_s22 = smov (!%p313_p5, %s1488_s22), 1  ;;  %s2149_s21 = smov (!%p325_p6, %s1484_s21), 1  ;;  %vm391_vm0 = vcmask 1040384   ;;  %vm488_vm1 = vcmask 1046528   ;;  %vm577_vm2 = vcmask 1045504   ;;  %vm683_vm3 = vcmask 130048  }
   0xf   : > { %s1347_s27 = sshll.u32 %s2147_s22, 3  ;;  %s1353_s28 = sshll.u32 %s2147_s22, 1  ;;  %vm666_vm4 = vcmask 64512   ;;  %vm735_vm5 = vcmask 195584   ;;  %vm1167_vm6 = vcmask 1041408  }
  0x10   : > { %s1346_s29 = sshll.u32 %s2149_s21, 2  ;;  %s1574_s30 = sadd.s32 %s1353_s28, %s2149_s21 }
  0x11   : > { %s329_s7 = sadd.s32 %s1347_s27, %s1346_s29  ;;  %s1344_s12 = sshll.u32 %s2147_s22, 5 }
  0x12   : > { %s1348_s8 = sshll.u32 %s329_s7, 3  ;;  %s2151_s26 = smov (!%p315_p7, %s1342_s26), 15 }
  0x13   : > { %s1579_s11 = scalar_lea.vmem %s2130_s1, %s1348_s8  ;;  %s1343_s13 = sshll.u32 %s2151_s26, 1 }
  0x14   : > { %v367_v0 = vld [vmem:[%s1579_s11] sm:$0xff]  ;;  %v1583_v1 = vld [vmem:[%s1579_s11 + $0x8] sm:$0xff]  ;;  %s1594_s14 = sadd.s32 %s1344_s12, %s1343_s13 }
  0x15   : > { %v392_v2 = vrot.slane %v367_v0, 7  ;;  %v393_v3 = vrot.slane %v1583_v1, 7  ;;  %s1345_s15 = sshll.u32 %s1594_s14, 3  ;;  %s1354_s14 = sshll.u32 %s1574_s30, 3 }
  0x16   : > { %s1607_s18 = scalar_lea.vmem %s2129_s0, %s1345_s15  ;;  %s1966_s26 = scalar_lea.vmem %s2134_s5, %s1345_s15 }
  0x17   : > { %v1587_v4 = vsel %vm391_vm0, %v392_v2, %v393_v3  ;;  %v1590_v5 = vsel %vm391_vm0, 0.0, %v392_v2  ;;  %v353_v12 = vld [vmem:[%s1607_s18 + $0x10] sm:$0xff]  ;;  %v354_v13 = vld [vmem:[%s1607_s18 + $0x18] sm:$0xff]  ;;  %v351_v14 = vld [vmem:[%s1607_s18] sm:$0xff]  ;;  %v462_v47 = vsel %vm391_vm0, %v393_v3, 0.0  ;;  %s350_s28 = scalar_lea.vmem %s2135_s6, %s1354_s14 }
  0x18   : > { %v489_v6 = vrot.slane %v1590_v5, 1  ;;  %v490_v7 = vrot.slane %v1587_v4, 1  ;;  %v578_v8 = vrot.slane %v1590_v5, 2  ;;  %v579_v9 = vrot.slane %v1587_v4, 2  ;;  %v352_v17 = vld [vmem:[%s1607_s18 + $0x8] sm:$0xff]  ;;  %v363_v19 = vld [vmem:[%s1607_s18 + $0x60] sm:$0xff] }
  0x19   : > { %v398_v15 = vrot.slane %v353_v12, 7  ;;  %v399_v16 = vrot.slane %v354_v13, 7  ;;  %v395_v18 = vrot.slane %v351_v14, 7  ;;  %v364_v20 = vld [vmem:[%s1607_s18 + $0x68] sm:$0xff]  ;;  %v396_v21 = vrot.slane %v352_v17, 7  ;;  %v355_v56 = vld [vmem:[%s1607_s18 + $0x20] sm:$0xff] }
  0x1a   : > { %v491_v10 = vsel %vm488_vm1, %v489_v6, %v490_v7  ;;  %v580_v11 = vsel %vm577_vm2, %v578_v8, %v579_v9  ;;  %v413_v22 = vrot.slane %v363_v19, 7  ;;  %v414_v23 = vrot.slane %v364_v20, 7  ;;  %v356_v57 = vld [vmem:[%s1607_s18 + $0x28] sm:$0xff]  ;;  %v366_v8 = vld [vmem:[%s1607_s18 + $0x78] sm:$0xff] }
  0x1b   : > { %529 = vrot.lane.b32.xlu1 %v491_v10, %s1502_s19  ;;  %618 = vrot.lane.b32.xlu2 %v580_v11, %s1503_s20  ;;  %v1621_v24 = vsel %vm391_vm0, %v398_v15, %v399_v16  ;;  %v1624_v25 = vsel %vm391_vm0, 0.0, %v398_v15  ;;  %v1627_v26 = vsel %vm391_vm0, 0.0, %v395_v18  ;;  %v1632_v29 = vsel %vm391_vm0, %v395_v18, %v396_v21 }
  0x1c   : > { %v499_v27 = vrot.slane %v1624_v25, 1  ;;  %v500_v28 = vrot.slane %v1621_v24, 1  ;;  %v494_v30 = vrot.slane %v1627_v26, 1  ;;  %v495_v31 = vrot.slane %v1632_v29, 1 }
  0x1d   : > { %v1638_v33 = vsel %vm391_vm0, %v413_v22, %v414_v23  ;;  %v1641_v34 = vsel %vm391_vm0, 0.0, %v413_v22  ;;  %v588_v36 = vrot.slane %v1624_v25, 2  ;;  %v589_v37 = vrot.slane %v1621_v24, 2 }
  0x1e   : > { %v501_v32 = vsel %vm488_vm1, %v499_v27, %v500_v28  ;;  %v496_v35 = vsel %vm488_vm1, %v494_v30, %v495_v31  ;;  %v524_v38 = vrot.slane %v1641_v34, 1  ;;  %v525_v39 = vrot.slane %v1638_v33, 1 }
  0x1f   : > { %537 = vrot.lane.b32.xlu0 %v501_v32, %s1502_s19  ;;  %v613_v40 = vrot.slane %v1641_v34, 2  ;;  %v614_v41 = vrot.slane %v1638_v33, 2  ;;  %v464_v43 = vsel %vm391_vm0, %v399_v16, 0.0  ;;  %v590_v44 = vsel %vm577_vm2, %v588_v36, %v589_v37  ;;  %v357_v36 = vld [vmem:[%s1607_s18 + $0x30] sm:$0xff] }
  0x20   : > { %v526_v42 = vsel %vm488_vm1, %v524_v38, %v525_v39  ;;  %v502_v45 = vrot.slane %v464_v43, 1  ;;  %v583_v48 = vrot.slane %v1627_v26, 2  ;;  %v584_v49 = vrot.slane %v1632_v29, 2 }
  0x21   : > { %v615_v46 = vsel %vm577_vm2, %v613_v40, %v614_v41  ;;  %v492_v51 = vrot.slane %v462_v47, 1  ;;  %v463_v52 = vsel %vm391_vm0, %v396_v21, 0.0  ;;  %v591_v58 = vrot.slane %v464_v43, 2 }
  0x22   : > { %v503_v50 = vsel %vm488_vm1, %v500_v28, %v502_v45  ;;  %v585_v53 = vsel %vm577_vm2, %v583_v48, %v584_v49  ;;  %v497_v54 = vrot.slane %v463_v52, 1  ;;  %v581_v60 = vrot.slane %v462_v47, 2 }
  0x23   : > { %533 = vrot.lane.b32.xlu1 %v496_v35, %s1502_s19  ;;  %557 = vrot.lane.b32.xlu2 %v526_v42, %s1502_s19  ;;  %v493_v55 = vsel %vm488_vm1, %v490_v7, %v492_v51  ;;  %v401_v61 = vrot.slane %v355_v56, 7  ;;  %v402_v62 = vrot.slane %v356_v57, 7  ;;  %v592_v63 = vsel %vm577_vm2, %v589_v37, %v591_v58  ;;  %v365_v7 = vld [vmem:[%s1607_s18 + $0x70] sm:$0xff]  ;;  %v358_v37 = vld [vmem:[%s1607_s18 + $0x38] sm:$0xff] }
  0x24   : > { %v498_v59 = vsel %vm488_vm1, %v495_v31, %v497_v54  ;;  %v586_v0 = vrot.slane %v463_v52, 2  ;;  %v582_v1 = vsel %vm577_vm2, %v579_v9, %v581_v60  ;;  %v469_v2 = vsel %vm391_vm0, %v414_v23, 0.0 }
  0x25   : > { %v1681_v3 = vsel %vm391_vm0, %v401_v61, %v402_v62  ;;  %v1684_v6 = vsel %vm391_vm0, 0.0, %v401_v61  ;;  %v527_v10 = vrot.slane %v469_v2, 1  ;;  %v416_v13 = vrot.slane %v365_v7, 7 }
  0x26   : > { %v587_v11 = vsel %vm577_vm2, %v584_v49, %v586_v0  ;;  %v504_v12 = vrot.slane %v1684_v6, 1  ;;  %v505_v9 = vrot.slane %v1681_v3, 1  ;;  %v417_v14 = vrot.slane %v366_v8, 7 }
  0x27   : > { %626 = vrot.lane.b32.xlu0 %v590_v44, %s1503_s20  ;;  %v528_v15 = vsel %vm488_vm1, %v525_v39, %v527_v10  ;;  %v593_v16 = vrot.slane %v1684_v6, 2  ;;  %v1701_v19 = vsel %vm391_vm0, 0.0, %v416_v13  ;;  %v594_v20 = vrot.slane %v1681_v3, 2  ;;  %v359_v10 = vld [vmem:[%s1607_s18 + $0x40] sm:$0xff] }
  0x28   : > { %v506_v17 = vsel %vm488_vm1, %v504_v12, %v505_v9  ;;  %v1698_v18 = vsel %vm391_vm0, %v416_v13, %v417_v14  ;;  %v616_v21 = vrot.slane %v469_v2, 2  ;;  %v716_v23 = vrot.slane %v1701_v19, 2  ;;  %v360_v13 = vld [vmem:[%s1607_s18 + $0x48] sm:$0xff] }
  0x29   : > { %v595_v22 = vsel %vm577_vm2, %v593_v16, %v594_v20  ;;  %v717_v27 = vrot.slane %v1698_v18, 2  ;;  %v465_v30 = vsel %vm391_vm0, %v402_v62, 0.0  ;;  %v470_v35 = vsel %vm391_vm0, %v417_v14, 0.0 }
  0x2a   : > { %v617_v28 = vsel %vm577_vm2, %v614_v41, %v616_v21  ;;  %v507_v32 = vrot.slane %v465_v30, 1  ;;  %v705_v38 = vrot.slane %v1701_v19, 1  ;;  %v706_v39 = vrot.slane %v1698_v18, 1 }
  0x2b   : > { %646 = vrot.lane.b32.xlu1 %v615_v46, %s1503_s20  ;;  %539 = vrot.lane.b32.xlu2 %v503_v50, %s1502_s19  ;;  %v718_v31 = vsel %vm577_vm2, %v716_v23, %v717_v27  ;;  %v708_v41 = vrot.slane %v470_v35, 1  ;;  %v404_v42 = vrot.slane %v357_v36, 7  ;;  %v405_v43 = vrot.slane %v358_v37, 7  ;;  %v361_v46 = vld [vmem:[%s1607_s18 + $0x50] sm:$0xff]  ;;  %v362_v50 = vld [vmem:[%s1607_s18 + $0x58] sm:$0xff] }
  0x2c   : > { %v508_v40 = vsel %vm488_vm1, %v505_v9, %v507_v32  ;;  %v707_v44 = vsel %vm488_vm1, %v705_v38, %v706_v39  ;;  %v719_v47 = vrot.slane %v470_v35, 2  ;;  %v596_v51 = vrot.slane %v465_v30, 2 }
  0x2d   : > { %v709_v45 = vsel %vm488_vm1, %v706_v39, %v708_v41  ;;  %v1726_v48 = vsel %vm391_vm0, %v404_v42, %v405_v43  ;;  %v1729_v49 = vsel %vm391_vm0, 0.0, %v404_v42  ;;  %v410_v52 = vrot.slane %v361_v46, 7  ;;  %v369_v42 = vld [vmem:[%s1579_s11 + $0x10] sm:$0xff] }
  0x2e   : > { %v598_v54 = vrot.slane %v1729_v49, 2  ;;  %v411_v56 = vrot.slane %v362_v50, 7  ;;  %v597_v57 = vsel %vm577_vm2, %v594_v20, %v596_v51  ;;  %v466_v62 = vsel %vm391_vm0, %v405_v43, 0.0  ;;  %v370_v43 = vld [vmem:[%s1579_s11 + $0x18] sm:$0xff]  ;;  %v702_v46 = vld [vmem:[%s2131_s2 + $0x10] sm:$0xff]  ;;  %v1798_v50 = vld [vmem:[%s2131_s2 + $0x40] sm:$0xff] }
  0x2f   : > { %622 = vrot.lane.b32.xlu0 %v585_v53, %s1503_s20  ;;  %v720_v53 = vsel %vm577_vm2, %v717_v27, %v719_v47  ;;  %v1740_v58 = vsel %vm391_vm0, 0.0, %v410_v52  ;;  %v509_v0 = vrot.slane %v1729_v49, 1  ;;  %v512_v7 = vrot.slane %v466_v62, 1  ;;  %v701_v47 = vld [vmem:[%s2131_s2 + $0x8] sm:$0xff]  ;;  %868 = vmatpush.msra.mxu1 %v702_v46 }
  0x30   : > { %v1744_v60 = vsel %vm391_vm0, %v410_v52, %v411_v56  ;;  %v519_v61 = vrot.slane %v1740_v58, 1  ;;  %v468_v9 = vsel %vm391_vm0, %v411_v56, 0.0  ;;  %v407_v14 = vrot.slane %v359_v10, 7  ;;  %971 = vmatpush.msra.mxu2 %v1798_v50  ;;  %v700_v56 = vld [vmem:[%s2131_s2] sm:$0xff] }
  0x31   : > { %v609_v16 = vrot.slane %v1744_v60, 2  ;;  %v611_v20 = vrot.slane %v468_v9, 2  ;;  %v408_v21 = vrot.slane %v360_v13, 7  ;;  %v522_v35 = vrot.slane %v468_v9, 1  ;;  %869 = vmatpush.msra.mxu1 %v701_v47  ;;  %v1355_v9 = vld [vmem:[%s2131_s2 + $0x18] sm:$0xff] }
  0x33   : > { %531 = vrot.lane.b32.xlu1 %v493_v55, %s1502_s19  ;;  %535 = vrot.lane.b32.xlu2 %v498_v59, %s1502_s19  ;;  %v599_v55 = vrot.slane %v1726_v48, 2  ;;  %v1773_v30 = vsel %vm391_vm0, %v407_v14, %v408_v21 }
  0x34   : > { %v515_v32 = vrot.slane %v1773_v30, 1  ;;  %v604_v41 = vrot.slane %v1773_v30, 2  ;;  %870 = vmatpush.msra.mxu1 %v700_v56 }
  0x35   : > { %v600_v59 = vsel %vm577_vm2, %v598_v54, %v599_v55  ;;  %v1391_v54 = vld [vmem:[%s2131_s2 + $0x38] sm:$0xff] }
  0x36   : > { %972 = vmatpush.msra.mxu2 %v1391_v54 }
  0x37   : > { %628 = vrot.lane.b32.xlu0 %v592_v63, %s1503_s20  ;;  %v520_v63 = vrot.slane %v1744_v60, 1 }
  0x39   : > { %v521_v2 = vsel %vm488_vm1, %v519_v61, %v520_v63  ;;  %v523_v38 = vsel %vm488_vm1, %v520_v63, %v522_v35 }
  0x3b   : > { %620 = vrot.lane.b32.xlu1 %v582_v1, %s1503_s20  ;;  %624 = vrot.lane.b32.xlu2 %v587_v11, %s1503_s20  ;;  %v510_v1 = vrot.slane %v1726_v48, 1  ;;  %v601_v11 = vrot.slane %v466_v62, 2 }
  0x3d   : > { %v511_v8 = vsel %vm488_vm1, %v509_v0, %v510_v1  ;;  %v513_v12 = vsel %vm488_vm1, %v510_v1, %v512_v7  ;;  %v1390_v1 = vld [vmem:[%s2131_s2 + $0x30] sm:$0xff]  ;;  %v1356_v7 = vld [vmem:[%s2131_s2 + $0x20] sm:$0xff] }
  0x3e   : > { %973 = vmatpush.msra.mxu2 %v1390_v1 }
  0x3f   : > { %559 = vrot.lane.b32.xlu0 %v528_v15, %s1502_s19  ;;  %v608_v15 = vrot.slane %v1740_v58, 2 }
  0x41   : > { %v610_v23 = vsel %vm577_vm2, %v608_v15, %v609_v16 }
  0x43   : > { %541 = vrot.lane.b32.xlu1 %v506_v17, %s1502_s19  ;;  %630 = vrot.lane.b32.xlu2 %v595_v22, %s1503_s20  ;;  %v602_v17 = vsel %vm577_vm2, %v599_v55, %v601_v11  ;;  %v1766_v22 = vsel %vm391_vm0, 0.0, %v407_v14 }
  0x44   : > { %v514_v27 = vrot.slane %v1766_v22, 1 }
  0x46   : > { %v516_v36 = vsel %vm488_vm1, %v514_v27, %v515_v32 }
  0x47   : > { %648 = vrot.lane.b32.xlu0 %v617_v28, %s1503_s20  ;;  %v612_v28 = vsel %vm577_vm2, %v609_v16, %v611_v20 }
  0x4b   : > { %721 = vrot.lane.b32.xlu1 %v718_v31, %s1503_s20  ;;  %543 = vrot.lane.b32.xlu2 %v508_v40, %s1502_s19  ;;  %v467_v31 = vsel %vm391_vm0, %v408_v21, 0.0  ;;  %v603_v40 = vrot.slane %v1766_v22, 2 }
  0x4c   : > { %v517_v37 = vrot.slane %v467_v31, 1  ;;  %v606_v51 = vrot.slane %v467_v31, 2 }
  0x4d   : > { %v605_v55 = vsel %vm577_vm2, %v603_v40, %v604_v41 }
  0x4e   : > { %v518_v39 = vsel %vm488_vm1, %v515_v32, %v517_v37 }
  0x4f   : > { %710 = vrot.lane.b32.xlu0 %v707_v44, %s1502_s19  ;;  %v419_v44 = vrot.slane %v369_v42, 7 }
  0x53   : > { %712 = vrot.lane.b32.xlu1 %v709_v45, %s1502_s19  ;;  %723 = vrot.lane.b32.xlu2 %v720_v53, %s1503_s20  ;;  %v420_v45 = vrot.slane %v370_v43, 7  ;;  %v1805_v53 = vsel %vm391_vm0, 0.0, %v419_v44 }
  0x54   : > { %v922_v63 = vrot.slane %v1805_v53, 1 }
  0x55   : > { %v1802_v52 = vsel %vm391_vm0, %v419_v44, %v420_v45  ;;  %v471_v11 = vsel %vm391_vm0, %v420_v45, 0.0 }
  0x56   : > { %v934_v61 = vrot.slane %v1802_v52, 2  ;;  %v923_v0 = vrot.slane %v1802_v52, 1  ;;  %v925_v27 = vrot.slane %v471_v11, 1 }
  0x57   : > { %632 = vrot.lane.b32.xlu0 %v597_v57, %s1503_s20  ;;  %v607_v57 = vsel %vm577_vm2, %v604_v41, %v606_v51 }
  0x5b   : > { %634 = vrot.lane.b32.xlu1 %v600_v59, %s1503_s20  ;;  %553 = vrot.lane.b32.xlu2 %v521_v2, %s1502_s19  ;;  %v933_v59 = vrot.slane %v1805_v53, 2  ;;  %v1357_v2 = vld [vmem:[%s2131_s2 + $0x28] sm:$0xff] }
  0x5c   : > { %797 = vmatpush.msra.mxu0 %v1357_v2  ;;  %1411 = vmatpush.msra.mxu3 %v1357_v2 }
  0x5d   : > { %v935_v62 = vsel %vm577_vm2, %v933_v59, %v934_v61 }
  0x5e   : > { %798 = vmatpush.msra.mxu0 %v1356_v7  ;;  %1412 = vmatpush.msra.mxu3 %v1356_v7 }
  0x5f   : > { %545 = vrot.lane.b32.xlu0 %v511_v8, %s1502_s19  ;;  %v924_v8 = vsel %vm488_vm1, %v922_v63, %v923_v0 }
  0x60   : > { %799 = vmatpush.msra.mxu0 %v1355_v9  ;;  %1413 = vmatpush.msra.mxu3 %v1355_v9 }
  0x62   : > { %1414 = vmatpush.msrb.mxu3 %v702_v46 }
  0x63   : > { %547 = vrot.lane.b32.xlu1 %v513_v12, %s1502_s19  ;;  %636 = vrot.lane.b32.xlu2 %v602_v17, %s1503_s20  ;;  %v936_v12 = vrot.slane %v471_v11, 2 }
  0x64   : > { %1415 = vmatpush.msrb.mxu3 %v701_v47 }
  0x65   : > { %v937_v13 = vsel %vm577_vm2, %v934_v61, %v936_v12 }
  0x66   : > { %1416 = vmatpush.msrb.mxu3 %v700_v56 }
  0x67   : > { %642 = vrot.lane.b32.xlu0 %v610_v23, %s1503_s20 }
  0x6b   : > { %644 = vrot.lane.b32.xlu1 %v612_v28, %s1503_s20  ;;  %549 = vrot.lane.b32.xlu2 %v516_v36, %s1502_s19  ;;  %v926_v28 = vsel %vm488_vm1, %v923_v0, %v925_v27 }
  0x6f   : > { %555 = vrot.lane.b32.xlu0 %v523_v38, %s1502_s19 }
  0x73   : > { %551 = vrot.lane.b32.xlu1 %v518_v39, %s1502_s19  ;;  %640 = vrot.lane.b32.xlu2 %v607_v57, %s1503_s20 }
  0x75   : > { %v619_v10 = vpop.permute.xlu2 %618 }
  0x77   : > { %638 = vrot.lane.b32.xlu0 %v605_v55, %s1503_s20 }
  0x7b   : > { %938 = vrot.lane.b32.xlu1 %v935_v62, %s1503_s20  ;;  %929 = vrot.lane.b32.xlu2 %v926_v28, %s1502_s19 }
  0x7d   : > { %v558_v14 = vpop.permute.xlu2 %557 }
  0x7e   : > { %v681_v31 = vsel %vm666_vm4, %v1641_v34, %v558_v14 }
  0x7f   : > { %927 = vrot.lane.b32.xlu0 %v924_v8, %s1502_s19 }
  0x85   : > { %v540_v21 = vpop.permute.xlu2 %539 }
  0x86   : > { %v672_v43 = vsel %vm666_vm4, %v1621_v24, %v540_v21 }
  0x87   : > { %940 = vrot.lane.b32.xlu0 %v937_v13, %s1503_s20 }
  0x8d   : > { %v530_v15 = vpop.permute.xlu1 %529  ;;  %v536_v37 = vpop.permute.xlu2 %535 }
  0x8e   : > { %v667_v16 = vsel %vm666_vm4, %v1590_v5, %v530_v15  ;;  %v670_v41 = vsel %vm666_vm4, %v1632_v29, %v536_v37 }
  0x8f   : > { %v684_v17 = vsel %vm683_vm3, %v667_v16, %v619_v10 }
  0x90   : > { %1374 = vmatmul.msk.f32.vlgmr.msra.gmra.mxu1 %vm735_vm5, %v684_v17 }
  0x91   : > { %v538_v20 = vpop.permute.xlu0 %537 }
  0x92   : > { %v671_v32 = vsel %vm666_vm4, %v1624_v25, %v538_v20 }
  0x95   : > { %v534_v23 = vpop.permute.xlu1 %533  ;;  %v625_v42 = vpop.permute.xlu2 %624 }
  0x96   : > { %v669_v34 = vsel %vm666_vm4, %v1627_v26, %v534_v23  ;;  %v687_v44 = vsel %vm683_vm3, %v670_v41, %v625_v42 }
  0x99   : > { %v627_v35 = vpop.permute.xlu0 %626 }
  0x9a   : > { %v688_v5 = vsel %vm683_vm3, %v671_v32, %v627_v35 }
  0x9b   : > { %1393 = vmatmul.msk.f32.vlgmr.msra.gmra.mxu2 %vm735_vm5, %v688_v5 }
  0x9d   : > { %v647_v36 = vpop.permute.xlu1 %646  ;;  %v631_v29 = vpop.permute.xlu2 %630 }
  0x9e   : > { %v1853_v38 = vsel %vm683_vm3, %v681_v31, %v647_v36 }
  0x9f   : > { %1370 = vmatmul.msk.f32.vlgmr.msra.gmra.mxu3 %vm735_vm5, %v1853_v38 }
  0xa0   : > { %1417 = vmatpush.msra.mxu3 %v1798_v50 }
  0xa1   : > { %v623_v25 = vpop.permute.xlu0 %622 }
  0xa2   : > { %1418 = vmatpush.msra.mxu3 %v1391_v54  ;;  %v686_v39 = vsel %vm683_vm3, %v669_v34, %v623_v25 }
  0xa3   : > { %1358 = vmatmul.msk.f32.vlgmr.msra.gmra.mxu0 %vm735_vm5, %v686_v39 }
  0xa4   : > { %1419 = vmatpush.msra.mxu3 %v1390_v1 }
  0xa5   : > { %v532_v40 = vpop.permute.xlu1 %531  ;;  %v544_v55 = vpop.permute.xlu2 %543 }
  0xa6   : > { %v668_v26 = vsel %vm666_vm4, %v1587_v4, %v532_v40  ;;  %v674_v2 = vsel %vm666_vm4, %v1681_v3, %v544_v55 }
  0xa9   : > { %v629_v45 = vpop.permute.xlu0 %628 }
  0xaa   : > { %v689_v46 = vsel %vm683_vm3, %v672_v43, %v629_v45 }
  0xab   : > { %1359 = vmatmul.msk.f32.gmra.mxu0 %vm735_vm5, %v687_v44  ;;  %1394 = vmatmul.msk.f32.gmra.mxu2 %vm735_vm5, %v689_v46 }
  0xad   : > { %v621_v47 = vpop.permute.xlu1 %620  ;;  %v724_v0 = vpop.permute.xlu2 %723 }
  0xae   : > { %v685_v50 = vsel %vm683_vm3, %v668_v26, %v621_v47 }
  0xaf   : > { %1375 = vmatmul.msk.f32.gmra.mxu1 %vm735_vm5, %v685_v50 }
  0xb1   : > { %v560_v51 = vpop.permute.xlu0 %559 }
  0xb2   : > { %v682_v56 = vsel %vm666_vm4, %v1638_v33, %v560_v51 }
  0xb3   : > { %1360 = vmatmul.msk.f32.gmra.mxu0 %vm735_vm5, %v688_v5 }
  0xb5   : > { %v542_v24 = vpop.permute.xlu1 %541  ;;  %v554_v11 = vpop.permute.xlu2 %553 }
  0xb6   : > { %v673_v54 = vsel %vm666_vm4, %v1684_v6, %v542_v24  ;;  %v679_v15 = vsel %vm666_vm4, %v1740_v58, %v554_v11 }
  0xb7   : > { %1376 = vmatmul.msk.f32.gmra.mxu1 %vm735_vm5, %v686_v39  ;;  %v690_v4 = vsel %vm683_vm3, %v673_v54, %v631_v29 }
  0xb8   : > { %1395 = vmatmul.msk.f32.gmra.mxu2 %vm735_vm5, %v690_v4 }
  0xb9   : > { %v649_v57 = vpop.permute.xlu0 %648 }
  0xba   : > { %v1883_v59 = vsel %vm683_vm3, %v682_v56, %v649_v57 }
  0xbb   : > { %1361 = vmatmul.msk.f32.gmra.mxu0 %vm735_vm5, %v689_v46  ;;  %1371 = vmatmul.msk.f32.gmra.mxu3 %vm735_vm5, %v1883_v59 }
  0xbd   : > { %v722_v61 = vpop.permute.xlu1 %721  ;;  %v637_v14 = vpop.permute.xlu2 %636 }
  0xbf   : > { %1377 = vmatmul.msk.f32.gmra.mxu1 %vm735_vm5, %v687_v44 }
  0xc1   : > { %v711_v6 = vpop.permute.xlu0 %710 }
  0xc2   : > { %v727_v62 = vsel %vm666_vm4, %v1701_v19, %v711_v6 }
  0xc3   : > { %1362 = vmatmul.msk.f32.gmra.mxu0 %vm735_vm5, %v690_v4  ;;  %v729_v33 = vsel %vm683_vm3, %v727_v62, %v722_v61 }
  0xc4   : > { %1372 = vmatmul.msk.f32.gmra.mxu3 %vm735_vm5, %v729_v33 }
  0xc5   : > { %v713_v63 = vpop.permute.xlu1 %712  ;;  %v550_v23 = vpop.permute.xlu2 %549 }
  0xc6   : > { %v728_v1 = vsel %vm666_vm4, %v1698_v18, %v713_v63  ;;  %v677_v27 = vsel %vm666_vm4, %v1766_v22, %v550_v23 }
  0xc7   : > { %1378 = vmatmul.msk.f32.gmra.mxu1 %vm735_vm5, %v688_v5  ;;  %v730_v8 = vsel %vm683_vm3, %v728_v1, %v724_v0 }
  0xc9   : > { %v633_v7 = vpop.permute.xlu0 %632 }
  0xca   : > { %v691_v19 = vsel %vm683_vm3, %v674_v2, %v633_v7 }
  0xcb   : > { %1363 = vmatmul.msk.f32.gmra.mxu0 %vm735_vm5, %v691_v19  ;;  %1396 = vmatmul.msk.f32.gmra.mxu2 %vm735_vm5, %v691_v19 }
  0xcc   : > { %1373 = vmatmul.msk.f32.gmra.mxu3 %vm735_vm5, %v730_v8 }
  0xcd   : > { %v635_v10 = vpop.permute.xlu1 %634  ;;  %v641_v35 = vpop.permute.xlu2 %640 }
  0xcf   : > { %1379 = vmatmul.msk.f32.gmra.mxu1 %vm735_vm5, %v689_v46 }
  0xd1   : > { %v546_v12 = vpop.permute.xlu0 %545 }
  0xd2   : > { %v675_v18 = vsel %vm666_vm4, %v1729_v49, %v546_v12 }
  0xd3   : > { %v692_v3 = vsel %vm683_vm3, %v675_v18, %v635_v10 }
  0xd4   : > { %1364 = vmatmul.msk.f32.gmra.mxu0 %vm735_vm5, %v692_v3  ;;  %1397 = vmatmul.msk.f32.gmra.mxu2 %vm735_vm5, %v692_v3 }
  0xd5   : > { %v548_v9 = vpop.permute.xlu1 %547  ;;  %v930_v34 = vpop.permute.xlu2 %929 }
  0xd6   : > { %v676_v13 = vsel %vm666_vm4, %v1726_v48, %v548_v9  ;;  %v945_v25 = vsel %vm666_vm4, %v1802_v52, %v930_v34 }
  0xd7   : > { %1380 = vmatmul.msk.f32.gmra.mxu1 %vm735_vm5, %v690_v4  ;;  %v693_v17 = vsel %vm683_vm3, %v676_v13, %v637_v14 }
  0xd9   : > { %v643_v16 = vpop.permute.xlu0 %642 }
  0xda   : > { %v696_v49 = vsel %vm683_vm3, %v679_v15, %v643_v16 }
  0xdb   : > { %1386 = vmatmul.msk.f32.vlgmr.msrb.gmra.mxu3 %vm735_vm5, %v696_v49 }
  0xdc   : > { %1398 = vmatmul.msk.f32.gmra.mxu2 %vm735_vm5, %v693_v17  ;;  %1365 = vmatmul.msk.f32.gmra.mxu0 %vm735_vm5, %v693_v17 }
  0xdd   : > { %v645_v20 = vpop.permute.xlu1 %644 }
  0xdf   : > { %1381 = vmatmul.msk.f32.gmra.mxu1 %vm735_vm5, %v691_v19 }
  0xe1   : > { %v556_v21 = vpop.permute.xlu0 %555 }
  0xe2   : > { %v680_v48 = vsel %vm666_vm4, %v1744_v60, %v556_v21 }
  0xe3   : > { %v697_v58 = vsel %vm683_vm3, %v680_v48, %v645_v20 }
  0xe4   : > { %1387 = vmatmul.msk.f32.gmra.mxu3 %vm735_vm5, %v697_v58 }
  0xe5   : > { %v552_v32 = vpop.permute.xlu1 %551 }
  0xe6   : > { %v678_v60 = vsel %vm666_vm4, %v1773_v30, %v552_v32 }
  0xe7   : > { %1382 = vmatmul.msk.f32.gmra.mxu1 %vm735_vm5, %v692_v3  ;;  %v695_v5 = vsel %vm683_vm3, %v678_v60, %v641_v35 }
  0xe9   : > { %v639_v28 = vpop.permute.xlu0 %638 }
  0xea   : > { %v694_v31 = vsel %vm683_vm3, %v677_v27, %v639_v28 }
  0xeb   : > { %1366 = vmatmul.msk.f32.gmra.mxu0 %vm735_vm5, %v694_v31  ;;  %1399 = vmatmul.msk.f32.gmra.mxu2 %vm735_vm5, %v694_v31 }
  0xec   : > { %1388 = vmatmul.msk.f32.gmra.mxu3 %vm735_vm5, %v1853_v38 }
  0xed   : > { %v939_v36 = vpop.permute.xlu1 %938 }
  0xef   : > { %1383 = vmatmul.msk.f32.gmra.mxu1 %vm735_vm5, %v693_v17 }
  0xf1   : > { %v928_v22 = vpop.permute.xlu0 %927 }
  0xf2   : > { %v944_v30 = vsel %vm666_vm4, %v1805_v53, %v928_v22 }
  0xf3   : > { %1367 = vmatmul.msk.f32.gmra.mxu0 %vm735_vm5, %v695_v5  ;;  %1400 = vmatmul.msk.f32.gmra.mxu2 %vm735_vm5, %v695_v5  ;;  %v946_v37 = vsel %vm683_vm3, %v944_v30, %v939_v36 }
  0xf4   : > { %1389 = vmatmul.msk.f32.gmra.mxu3 %vm735_vm5, %v1883_v59 }
  0xf7   : > { %1384 = vmatmul.msk.f32.gmra.mxu1 %vm735_vm5, %v694_v31 }
  0xf9   : > { %v941_v39 = vpop.permute.xlu0 %940 }
  0xfa   : > { %v947_v40 = vsel %vm683_vm3, %v945_v25, %v941_v39 }
  0xfb   : > { %1368 = vmatmul.msk.f32.gmra.mxu0 %vm735_vm5, %v696_v49  ;;  %1401 = vmatmul.msk.f32.gmra.mxu2 %vm735_vm5, %v696_v49 }
  0xfc   : > { %1405 = vmatmul.msk.f32.vlgmr.msra.gmra.mxu3 %vm735_vm5, %v729_v33 }
  0xff   : > { %1385 = vmatmul.msk.f32.gmra.mxu1 %vm735_vm5, %v695_v5 }
 0x103   : > { %1369 = vmatmul.msk.f32.gmra.mxu0 %vm735_vm5, %v697_v58  ;;  %1402 = vmatmul.msk.f32.gmra.mxu2 %vm735_vm5, %v697_v58 }
 0x104   : > { %1406 = vmatmul.msk.f32.gmra.mxu3 %vm735_vm5, %v730_v8 }
 0x10b   : > { %1403 = vmatmul.msk.f32.gmra.mxu2 %vm735_vm5, %v1853_v38 }
 0x10c   : > { %1407 = vmatmul.msk.f32.gmra.mxu3 %vm735_vm5, %v946_v37 }
 0x10d   : > { %v872_v53 = vpop.f32.mrf.mxu1 }
 0x113   : > { %1404 = vmatmul.msk.f32.gmra.mxu2 %vm735_vm5, %v1883_v59 }
 0x114   : > { %1408 = vmatmul.msk.f32.gmra.mxu3 %vm735_vm5, %v947_v40 }
 0x11e   : > { %v975_v52 = vpop.f32.mrf.mxu2 }
 0x120   : > { %v801_v41 = vpop.f32.mrf.mxu0 }
 0x121   : > { %v873_v42 = vadd.f32 %v872_v53, %v801_v41 }
 0x122   : > { %v837_v54 = vpop.f32.mrf.mxu3 }
 0x123   : > { %v1968_v38 = vadd.f32 %v975_v52, %v873_v42 }
 0x125   : > { %1039 = vst.msk [vmem:[%s1966_s26] sm:$0xff] %vm666_vm4, %v1968_v38  ;;  %v1055_v52 = vsel %vm666_vm4, %v1968_v38, 0.0 }
 0x128   : > { %v804_v44 = vpop.f32.mrf.mxu0 }
 0x12c   : > { %v875_v43 = vpop.f32.mrf.mxu1 }
 0x12d   : > { %v876_v45 = vadd.f32 %v875_v43, %v804_v44 }
 0x12e   : > { %v978_v26 = vpop.f32.mrf.mxu2 }
 0x12f   : > { %v1973_v46 = vadd.f32 %v978_v26, %v876_v45 }
 0x130   : > { %v807_v50 = vpop.f32.mrf.mxu0 }
 0x131   : > { %1040 = vst.msk [vmem:[%s1966_s26 + $0x8] sm:$0xff] %vm666_vm4, %v1973_v46 }
 0x134   : > { %v878_v47 = vpop.f32.mrf.mxu1 }
 0x135   : > { %v879_v29 = vadd.f32 %v878_v47, %v807_v50 }
 0x138   : > { %v810_v56 = vpop.f32.mrf.mxu0 }
 0x13b   : > { %v981_v51 = vpop.f32.mrf.mxu2 }
 0x13c   : > { %v1978_v24 = vadd.f32 %v981_v51, %v879_v29  ;;  %v881_v4 = vpop.f32.mrf.mxu1 }
 0x13d   : > { %v882_v59 = vadd.f32 %v881_v4, %v810_v56 }
 0x13e   : > { %1041 = vst.msk [vmem:[%s1966_s26 + $0x10] sm:$0xff] %vm666_vm4, %v1978_v24  ;;  %v840_v55 = vpop.f32.mrf.mxu3  ;;  %v1056_v42 = vsel %vm666_vm4, %v1978_v24, 0.0 }
 0x13f   : > { %v1057_v44 = vadd.f32 %v1056_v42, %v1055_v52 }
 0x140   : > { %v813_v63 = vpop.f32.mrf.mxu0 }
 0x144   : > { %v884_v57 = vpop.f32.mrf.mxu1 }
 0x145   : > { %v885_v33 = vadd.f32 %v884_v57, %v813_v63 }
 0x147   : > { %v843_v61 = vpop.f32.mrf.mxu3 }
 0x148   : > { %v816_v8 = vpop.f32.mrf.mxu0 }
 0x14c   : > { %v887_v0 = vpop.f32.mrf.mxu1 }
 0x14d   : > { %v888_v19 = vadd.f32 %v887_v0, %v816_v8 }
 0x14e   : > { %v984_v6 = vpop.f32.mrf.mxu2 }
 0x14f   : > { %v1983_v62 = vadd.f32 %v984_v6, %v882_v59  ;;  %v1988_v1 = vpop.f32.mrf.mxu3  ;;  %v1070_v59 = vsel %vm666_vm4, %v1973_v46, 0.0 }
 0x151   : > { %1042 = vst.msk [vmem:[%s1966_s26 + $0x18] sm:$0xff] %vm666_vm4, %v1983_v62  ;;  %v819_v3 = vpop.f32.mrf.mxu0  ;;  %v1071_v51 = vsel %vm666_vm4, %v1983_v62, 0.0 }
 0x152   : > { %v1072_v63 = vadd.f32 %v1071_v51, %v1070_v59 }
 0x154   : > { %v890_v11 = vpop.f32.mrf.mxu1 }
 0x155   : > { %v891_v15 = vadd.f32 %v890_v11, %v819_v3 }
 0x157   : > { %v987_v2 = vpop.f32.mrf.mxu2 }
 0x158   : > { %v1990_v7 = vadd.f32 %v987_v2, %v885_v33 }
 0x159   : > { %v822_v14 = vpop.f32.mrf.mxu0 }
 0x15a   : > { %1043 = vst.msk [vmem:[%s1966_s26 + $0x20] sm:$0xff] %vm666_vm4, %v1990_v7  ;;  %v1058_v43 = vsel %vm666_vm4, %v1990_v7, 0.0 }
 0x15b   : > { %v1059_v47 = vadd.f32 %v1058_v43, %v1057_v44 }
 0x15c   : > { %v893_v13 = vpop.f32.mrf.mxu1 }
 0x15d   : > { %v894_v48 = vadd.f32 %v893_v13, %v822_v14 }
 0x15e   : > { %v908_v10 = vpop.f32.mrf.mxu3 }
 0x15f   : > { %v990_v12 = vpop.f32.mrf.mxu2  ;;  %v909_v32 = vadd.f32 %v908_v10, %v837_v54 }
 0x160   : > { %v1995_v18 = vadd.f32 %v990_v12, %v888_v19 }
 0x162   : > { %1044 = vst.msk [vmem:[%s1966_s26 + $0x28] sm:$0xff] %vm666_vm4, %v1995_v18  ;;  %v1073_v6 = vsel %vm666_vm4, %v1995_v18, 0.0 }
 0x163   : > { %v1074_v19 = vadd.f32 %v1073_v6, %v1072_v63 }
 0x164   : > { %v896_v20 = vpop.f32.mrf.mxu1 }
 0x167   : > { %v911_v9 = vpop.f32.mrf.mxu3 }
 0x168   : > { %v825_v21 = vpop.f32.mrf.mxu0  ;;  %v912_v37 = vadd.f32 %v911_v9, %v840_v55 }
 0x169   : > { %v897_v28 = vadd.f32 %v896_v20, %v825_v21 }
 0x16c   : > { %v899_v31 = vpop.f32.mrf.mxu1 }
 0x16e   : > { %v993_v16 = vpop.f32.mrf.mxu2 }
 0x16f   : > { %v2000_v17 = vadd.f32 %v993_v16, %v891_v15  ;;  %v914_v49 = vpop.f32.mrf.mxu3 }
 0x170   : > { %v828_v60 = vpop.f32.mrf.mxu0  ;;  %v915_v50 = vadd.f32 %v914_v49, %v843_v61 }
 0x171   : > { %1045 = vst.msk [vmem:[%s1966_s26 + $0x30] sm:$0xff] %vm666_vm4, %v2000_v17  ;;  %v900_v36 = vadd.f32 %v899_v31, %v828_v60  ;;  %v1060_v45 = vsel %vm666_vm4, %v2000_v17, 0.0 }
 0x172   : > { %v1061_v56 = vadd.f32 %v1060_v45, %v1059_v47 }
 0x174   : > { %v902_v40 = vpop.f32.mrf.mxu1 }
 0x176   : > { %v996_v58 = vpop.f32.mrf.mxu2 }
 0x177   : > { %v2005_v23 = vadd.f32 %v996_v58, %v894_v48  ;;  %v917_v27 = vpop.f32.mrf.mxu3 }
 0x178   : > { %v831_v53 = vpop.f32.mrf.mxu0  ;;  %v918_v9 = vadd.f32 %v917_v27, %v1988_v1 }
 0x179   : > { %1046 = vst.msk [vmem:[%s1966_s26 + $0x38] sm:$0xff] %vm666_vm4, %v2005_v23  ;;  %v903_v26 = vadd.f32 %v902_v40, %v831_v53  ;;  %v1075_v8 = vsel %vm666_vm4, %v2005_v23, 0.0 }
 0x17a   : > { %v1076_v3 = vadd.f32 %v1075_v8, %v1074_v19 }
 0x17c   : > { %v905_v33 = vpop.f32.mrf.mxu1 }
 0x17e   : > { %v999_v35 = vpop.f32.mrf.mxu2 }
 0x17f   : > { %v2010_v5 = vadd.f32 %v999_v35, %v897_v28  ;;  %v1011_v22 = vpop.f32.mrf.mxu3 }
 0x180   : > { %v2012_v30 = vadd.f32 %v1011_v22, %v909_v32  ;;  %v834_v2 = vpop.f32.mrf.mxu0 }
 0x181   : > { %1047 = vst.msk [vmem:[%s1966_s26 + $0x40] sm:$0xff] %vm666_vm4, %v2010_v5  ;;  %v1062_v54 = vsel %vm666_vm4, %v2010_v5, 0.0  ;;  %v906_v11 = vadd.f32 %v905_v33, %v834_v2 }
 0x182   : > { %1051 = vst.msk [vmem:[%s1966_s26 + $0x60] sm:$0xff] %vm666_vm4, %v2012_v30  ;;  %v1063_v0 = vadd.f32 %v1062_v54, %v1061_v56  ;;  %v1066_v14 = vsel %vm666_vm4, %v2012_v30, 0.0 }
 0x186   : > { %v1002_v34 = vpop.f32.mrf.mxu2 }
 0x187   : > { %v2020_v25 = vadd.f32 %v1002_v34, %v900_v36  ;;  %v1014_v39 = vpop.f32.mrf.mxu3 }
 0x188   : > { %v2022_v41 = vadd.f32 %v1014_v39, %v912_v37 }
 0x189   : > { %1048 = vst.msk [vmem:[%s1966_s26 + $0x48] sm:$0xff] %vm666_vm4, %v2020_v25  ;;  %v1077_v12 = vsel %vm666_vm4, %v2020_v25, 0.0 }
 0x18a   : > { %1052 = vst.msk [vmem:[%s1966_s26 + $0x68] sm:$0xff] %vm666_vm4, %v2022_v41  ;;  %v1078_v49 = vadd.f32 %v1077_v12, %v1076_v3  ;;  %v1081_v28 = vsel %vm666_vm4, %v2022_v41, 0.0 }
 0x18e   : > { %v1005_v29 = vpop.f32.mrf.mxu2 }
 0x18f   : > { %v1033_v4 = vadd.f32 %v1005_v29, %v903_v26  ;;  %v1017_v55 = vpop.f32.mrf.mxu3 }
 0x190   : > { %v2042_v57 = vadd.f32 %v1017_v55, %v915_v50 }
 0x191   : > { %1049 = vst.msk [vmem:[%s1966_s26 + $0x50] sm:$0xff] %vm666_vm4, %v1033_v4  ;;  %v1064_v61 = vsel %vm666_vm4, %v1033_v4, 0.0 }
 0x192   : > { %1053 = vst.msk [vmem:[%s1966_s26 + $0x70] sm:$0xff] %vm666_vm4, %v2042_v57  ;;  %v1065_v10 = vadd.f32 %v1064_v61, %v1063_v0  ;;  %v1068_v1 = vsel %vm666_vm4, %v2042_v57, 0.0 }
 0x194   : > { %v1067_v20 = vadd.f32 %v1066_v14, %v1065_v10 }
 0x196   : > { %v1008_v13 = vpop.f32.mrf.mxu2  ;;  %v1069_v27 = vadd.f32 %v1068_v1, %v1067_v20 }
 0x197   : > { %v1034_v15 = vadd.f32 %v1008_v13, %v906_v11  ;;  %v1020_v16 = vpop.f32.mrf.mxu3 }
 0x198   : > { %v1038_v21 = vadd.f32 %v1020_v16, %v918_v9  ;;  %v1085_v35 = vsel %vm666_vm4, %v1069_v27, 0.0 }
 0x199   : > { %1050 = vst.msk [vmem:[%s1966_s26 + $0x58] sm:$0xff] %vm666_vm4, %v1034_v15  ;;  %v1079_v48 = vsel %vm666_vm4, %v1034_v15, 0.0 }
 0x19a   : > { %v1080_v58 = vadd.f32 %v1079_v48, %v1078_v49  ;;  %1054 = vst.msk [vmem:[%s1966_s26 + $0x78] sm:$0xff] %vm666_vm4, %v1038_v21  ;;  %v1083_v32 = vsel %vm666_vm4, %v1038_v21, 0.0 }
 0x19c   : > { %v1082_v31 = vadd.f32 %v1081_v28, %v1080_v58 }
 0x19e   : > { %v1084_v60 = vadd.f32 %v1083_v32, %v1082_v31 }
 0x1a0   : > { %v1086_v22 = vsel %vm666_vm4, %v1084_v60, 0.0 }
 0x1a1   : > { %v1087_v36 = vadd.f32 %v1086_v22, %v1085_v35 }
 0x1a3   : > { %v1088_v37 = vrot.slane %v1087_v36, 4 }
 0x1a5   : > { %v1089_v34 = vadd.f32 %v1088_v37, %v1087_v36 }
 0x1a7   : > { %v1090_v39 = vrot.slane %v1089_v34, 2 }
 0x1a9   : > { %v1091_v40 = vadd.f32 %v1090_v39, %v1089_v34 }
 0x1ab   : > { %v1092_v53 = vrot.slane %v1091_v40, 1 }
 0x1ad   : > { %v2073_v42 = vadd.f32 %v1092_v53, %v1091_v40 }
 0x1af   : > { %v1094_v52 = vmul.f32 0.0078125, %v2073_v42 }
 0x1b1   : > { %v1095_v43 = vsub.f32 %v1968_v38, %v1094_v52  ;;  %v1097_v44 = vsub.f32 %v1978_v24, %v1094_v52  ;;  %v1096_v45 = vsub.f32 %v1973_v46, %v1094_v52  ;;  %v1098_v26 = vsub.f32 %v1983_v62, %v1094_v52 }
 0x1b2   : > { %v1099_v47 = vsub.f32 %v1990_v7, %v1094_v52  ;;  %v1100_v50 = vsub.f32 %v1995_v18, %v1094_v52  ;;  %v1101_v29 = vsub.f32 %v2000_v17, %v1094_v52  ;;  %v1102_v55 = vsub.f32 %v2005_v23, %v1094_v52 }
 0x1b3   : > { %v1111_v51 = vmul.f32 %v1095_v43, %v1095_v43  ;;  %v1113_v54 = vmul.f32 %v1097_v44, %v1097_v44  ;;  %v1103_v56 = vsub.f32 %v2010_v5, %v1094_v52  ;;  %v1112_v59 = vmul.f32 %v1096_v45, %v1096_v45 }
 0x1b4   : > { %v1114_v38 = vmul.f32 %v1098_v26, %v1098_v26  ;;  %v1115_v6 = vmul.f32 %v1099_v47, %v1099_v47  ;;  %v1104_v24 = vsub.f32 %v2020_v25, %v1094_v52  ;;  %v1105_v46 = vsub.f32 %v1033_v4, %v1094_v52 }
 0x1b5   : > { %v1116_v61 = vmul.f32 %v1100_v50, %v1100_v50  ;;  %v1117_v62 = vmul.f32 %v1101_v29, %v1101_v29  ;;  %v1127_v7 = vsel %vm666_vm4, %v1111_v51, 0.0  ;;  %v1128_v18 = vsel %vm666_vm4, %v1113_v54, 0.0 }
 0x1b6   : > { %v1106_v63 = vsub.f32 %v1034_v15, %v1094_v52  ;;  %v1107_v17 = vsub.f32 %v2012_v30, %v1094_v52  ;;  %v1118_v0 = vmul.f32 %v1102_v55, %v1102_v55  ;;  %v1129_v33 = vadd.f32 %v1128_v18, %v1127_v7 }
 0x1b7   : > { %v1119_v23 = vmul.f32 %v1103_v56, %v1103_v56  ;;  %v1130_v5 = vsel %vm666_vm4, %v1115_v6, 0.0  ;;  %v1142_v2 = vsel %vm666_vm4, %v1112_v59, 0.0  ;;  %v1143_v8 = vsel %vm666_vm4, %v1114_v38, 0.0 }
 0x1b8   : > { %v1108_v25 = vsub.f32 %v2022_v41, %v1094_v52  ;;  %v1109_v4 = vsub.f32 %v2042_v57, %v1094_v52  ;;  %v1131_v19 = vadd.f32 %v1130_v5, %v1129_v33  ;;  %v1144_v10 = vadd.f32 %v1143_v8, %v1142_v2 }
 0x1b9   : > { %v1120_v11 = vmul.f32 %v1104_v24, %v1104_v24  ;;  %v1121_v12 = vmul.f32 %v1105_v46, %v1105_v46  ;;  %v1132_v3 = vsel %vm666_vm4, %v1117_v62, 0.0  ;;  %v1145_v30 = vsel %vm666_vm4, %v1116_v61, 0.0 }
 0x1ba   : > { %v1110_v9 = vsub.f32 %v1038_v21, %v1094_v52  ;;  %v1133_v13 = vadd.f32 %v1132_v3, %v1131_v19  ;;  %v1146_v14 = vadd.f32 %v1145_v30, %v1144_v10  ;;  %v1122_v15 = vmul.f32 %v1106_v63, %v1106_v63 }
 0x1bb   : > { %v1123_v16 = vmul.f32 %v1107_v17, %v1107_v17  ;;  %v1134_v49 = vsel %vm666_vm4, %v1119_v23, 0.0  ;;  %v1147_v20 = vsel %vm666_vm4, %v1118_v0, 0.0  ;;  %v1124_v57 = vmul.f32 %v1108_v25, %v1108_v25 }
 0x1bc   : > { %v1135_v41 = vadd.f32 %v1134_v49, %v1133_v13  ;;  %v1148_v48 = vadd.f32 %v1147_v20, %v1146_v14  ;;  %v1125_v58 = vmul.f32 %v1109_v4, %v1109_v4  ;;  %v1136_v28 = vsel %vm666_vm4, %v1121_v12, 0.0 }
 0x1bd   : > { %v1149_v1 = vsel %vm666_vm4, %v1120_v11, 0.0  ;;  %v1126_v32 = vmul.f32 %v1110_v9, %v1110_v9  ;;  %v1138_v21 = vsel %vm666_vm4, %v1123_v16, 0.0  ;;  %v1151_v60 = vsel %vm666_vm4, %v1122_v15, 0.0 }
 0x1be   : > { %v1137_v27 = vadd.f32 %v1136_v28, %v1135_v41  ;;  %v1150_v31 = vadd.f32 %v1149_v1, %v1148_v48  ;;  %v1140_v36 = vsel %vm666_vm4, %v1125_v58, 0.0  ;;  %v1153_v37 = vsel %vm666_vm4, %v1124_v57, 0.0 }
 0x1bf   : > { %v1155_v40 = vsel %vm666_vm4, %v1126_v32, 0.0 }
 0x1c0   : > { %v1139_v35 = vadd.f32 %v1138_v21, %v1137_v27  ;;  %v1152_v22 = vadd.f32 %v1151_v60, %v1150_v31 }
 0x1c2   : > { %v1141_v34 = vadd.f32 %v1140_v36, %v1139_v35  ;;  %v1154_v39 = vadd.f32 %v1153_v37, %v1152_v22 }
 0x1c4   : > { %v1156_v53 = vadd.f32 %v1155_v40, %v1154_v39  ;;  %v1157_v52 = vsel %vm666_vm4, %v1141_v34, 0.0 }
 0x1c6   : > { %v1158_v43 = vsel %vm666_vm4, %v1156_v53, 0.0 }
 0x1c7   : > { %v1159_v44 = vadd.f32 %v1158_v43, %v1157_v52 }
 0x1c9   : > { %v1160_v45 = vrot.slane %v1159_v44, 4 }
 0x1cb   : > { %v1161_v26 = vadd.f32 %v1160_v45, %v1159_v44 }
 0x1cd   : > { %v1162_v47 = vrot.slane %v1161_v26, 2 }
 0x1cf   : > { %v1163_v50 = vadd.f32 %v1162_v47, %v1161_v26 }
 0x1d1   : > { %v1164_v29 = vrot.slane %v1163_v50, 1 }
 0x1d3   : > { %v1165_v51 = vadd.f32 %v1164_v29, %v1163_v50 }
 0x1d5   : > { %v1166_v54 = vsel %vm391_vm0, %v2073_v42, %v1165_v51 }
 0x1d6   : > { %v1168_v55 = vsel %vm1167_vm6, %v1166_v54, 0.0 }
 0x1d7   : > { %1169 = vst.msk [vmem:[%s350_s28] sm:$0xff] %vm666_vm4, %v1168_v55 }
 0x1d8 PF: > { %s17_s25 = sadd.s32 1, %s1500_s25   ;;  %s2136_s21 = smov %s1492_s23 }
 0x1d9   : > { %p14_p8 = scmp.ge.s32.totalorder %s17_s25, 6   ;;  %s2137_s22 = smov %s1496_s24 }
 0x1da   : > { %s2138_s23 = smov %s2141_s3  ;;  %s2139_s24 = smov %s2145_s4 }
 0x1db   :  { %16 = sbr.rel (!%p14_p8) target bundleno = 3 (0x3), region = 87 }

</bundles_post_ra>
